<compile_context>
chip_gen: v7x
topology: tpu7x:2x2x1
jax: 0.10.0
libtpu: 0.0.40
codegen_flags: <defaults>
</compile_context>

<pallas_src>
import functools
import math

import jax
import jax.numpy as jnp
from jax.experimental import pallas as pl
from jax.experimental.pallas import tpu as pltpu


# ----------------------------------------------------------------------------
# helpers
# ----------------------------------------------------------------------------

_ROW_TILE = 512            # preferred M tile (measured ~85% HBM roofline on v6e)
_K_TILE = 256              # contraction tile
_LANE_TILE = 512           # preferred lane-axis tile for wide dims (Dff chunks)
_VMEM_LIMIT = 48 * 1024 * 1024   # above v5e/v6e scoped defaults, < v7x 64 MiB phys


def _round_up(x, m):
    return ((x + m - 1) // m) * m


def _pad_to(x, axis, target):
    pad = target - x.shape[axis]
    if pad == 0:
        return x
    widths = [(0, 0)] * x.ndim
    widths[axis] = (0, pad)
    return jnp.pad(x, widths)


def _pick_tile_m(M, pref):
    """Row tile (sublane axis): a multiple of 8 dividing M when possible
    (avoids pad/slice copies), capped at `pref`, and < M when M >= 16 so a
    'parallel' grid axis of extent >= 2 exists (keeps both v7x TCs busy)."""
    if M <= pref:
        if M <= 8 or M % 8 != 0:
            return M                       # full dim is always a legal block dim
        cap = max(8, ((M // 2) // 8) * 8)
    else:
        cap = pref
    for t in range(cap, 7, -8):
        if M % t == 0:
            return t
    return cap                              # fallback: pad M up to a multiple


def _pick_tile_lane(N, pref):
    """Lane-axis tile: full dim if it fits, else `pref` (a multiple of 128)."""
    return N if N <= pref else pref


def _cparams(semantics):
    return pltpu.CompilerParams(
        dimension_semantics=semantics,
        vmem_limit_bytes=_VMEM_LIMIT,
    )


# ----------------------------------------------------------------------------
# Grouped projection:  y[g] = x @ w[g] + b[g]     (fused QKV / KV / single)
# ----------------------------------------------------------------------------

def _grouped_linear_kernel(x_ref, w_ref, b_ref, o_ref, acc_ref):
    @pl.when(pl.program_id(2) == 0)
    def _():
        acc_ref[...] = jnp.zeros_like(acc_ref)

    # x arrives in its stored dtype (f32 activations); cast in-kernel so no
    # separate XLA cast pass over HBM is needed.  Weights are pre-cast bf16.
    acc_ref[...] += jnp.dot(x_ref[...].astype(jnp.bfloat16), w_ref[0],
                            preferred_element_type=jnp.float32)

    @pl.when(pl.program_id(2) == pl.num_programs(2) - 1)
    def _():
        o_ref[0] = (acc_ref[...] + b_ref[0]).astype(o_ref.dtype)


def grouped_linear(x, w_g, b_g, out_dtype=jnp.bfloat16):
    """x: (..., K); w_g: (G, K, Dg) bf16; b_g: (G, 1, Dg) f32 -> (G, ..., Dg).

    Output is grouped along a leading axis so downstream kernels (attention)
    can index q/k/v directly via BlockSpec group indices — no split/transpose.
    """
    *lead, K = x.shape
    G, Kw, Dg = w_g.shape
    assert Kw == K
    x2 = x.reshape(-1, K)
    M = x2.shape[0]

    tm = _pick_tile_m(M, _ROW_TILE)
    tk = _pick_tile_lane(K, _K_TILE)
    Mp, Kp = _round_up(M, tm), _round_up(K, tk)
    # TODO(synk): ragged tails could be handled with masked last blocks instead
    # of zero padding; at the shapes used here no padding occurs.
    xp = _pad_to(_pad_to(x2, 0, Mp), 1, Kp)
    wp = _pad_to(w_g, 1, Kp)                 # zero K-pad keeps the matmul exact
    gm, gk = Mp // tm, Kp // tk

    cost = pl.CostEstimate(
        flops=2 * Mp * Kp * Dg * G,
        transcendentals=0,
        bytes_accessed=(x2.dtype.itemsize * Mp * Kp * G       # x refetched per group
                        + 2 * G * Kp * Dg * gm                 # bf16 W refetched per M tile
                        + 4 * G * Dg * gm
                        + jnp.dtype(out_dtype).itemsize * G * Mp * Dg),
    )

    out = pl.pallas_call(
        _grouped_linear_kernel,
        out_shape=jax.ShapeDtypeStruct((G, Mp, Dg), out_dtype),
        grid=(gm, G, gk),                    # K axis last -> accumulator resident
        in_specs=[
            pl.BlockSpec((tm, tk), lambda i, j, k: (i, k)),
            pl.BlockSpec((1, tk, Dg), lambda i, j, k: (j, k, 0)),
            pl.BlockSpec((1, 1, Dg), lambda i, j, k: (j, 0, 0)),
        ],
        out_specs=pl.BlockSpec((1, tm, Dg), lambda i, j, k: (j, i, 0)),
        scratch_shapes=[pltpu.VMEM((tm, Dg), jnp.float32)],
        compiler_params=_cparams(("parallel", "parallel", "arbitrary")),
        cost_estimate=cost,
    )(xp, wp, b_g)
    if Mp != M:
        out = out[:, :M]
    return out.reshape(G, *lead, Dg)


# ----------------------------------------------------------------------------
# Attention: one (batch, q-tile) block per grid step, q/k/v read directly from
# the grouped projection output.
# ----------------------------------------------------------------------------

def _attn_kernel(q_ref, k_ref, v_ref, o_ref, *, num_heads):
    # q_ref: (1, 1, tq, D); k_ref/v_ref: (1, 1, Lk, D); o_ref: (1, tq, D), bf16.
    # 1/sqrt(hd) is pre-folded into the Q projection weights; softmax
    # normalization is deferred until after the PV matmul.
    D = q_ref.shape[-1]
    hd = D // num_heads
    q = q_ref[0, 0]
    k = k_ref[0, 0]
    v = v_ref[0, 0]
    outs = []
    for h in range(num_heads):                       # static, small head count
        sl = slice(h * hd, (h + 1) * hd)
        s = jax.lax.dot_general(q[:, sl], k[:, sl], (((1,), (1,)), ((), ())),
                                preferred_element_type=jnp.float32)   # (tq, Lk)
        m = jnp.max(s, axis=-1, keepdims=True)
        p = jnp.exp(s - m)
        denom = jnp.sum(p, axis=-1, keepdims=True)
        o_h = jnp.dot(p.astype(v.dtype), v[:, sl],
                      preferred_element_type=jnp.float32)             # (tq, hd)
        outs.append(o_h * pl.reciprocal(denom, approx=True))          # EUP slot
    o_ref[0] = jnp.concatenate(outs, axis=-1).astype(o_ref.dtype)


def attention(q_arr, kv_arr, *, num_heads, q_group, k_group, v_group):
    """q_arr: (Gq, B, Lq, D) bf16; kv_arr: (Gkv, B, Lk, D) bf16 -> (B, Lq, D) bf16."""
    _, B, Lq, D = q_arr.shape
    Lk = kv_arr.shape[2]
    tq = _pick_tile_m(Lq, 256)
    Lqp = _round_up(Lq, tq)
    if Lqp != Lq:
        q_arr = _pad_to(q_arr, 2, Lqp)       # key length never padded -> exact softmax
    # TODO(synk): for long key sequences on v7x, stream K/V with a kv grid axis
    # + online softmax instead of holding (Lk, D) resident (Lk = N_map is tiny here).
    out = pl.pallas_call(
        functools.partial(_attn_kernel, num_heads=num_heads),
        out_shape=jax.ShapeDtypeStruct((B, Lqp, D), jnp.bfloat16),
        grid=(B, Lqp // tq),
        in_specs=[
            pl.BlockSpec((1, 1, tq, D), lambda b, qi: (q_group, b, qi, 0)),
            pl.BlockSpec((1, 1, Lk, D), lambda b, qi: (k_group, b, 0, 0)),
            pl.BlockSpec((1, 1, Lk, D), lambda b, qi: (v_group, b, 0, 0)),
        ],
        out_specs=pl.BlockSpec((1, tq, D), lambda b, qi: (b, qi, 0)),
        compiler_params=_cparams(("parallel", "parallel")),
    )(q_arr, kv_arr, kv_arr)
    if Lqp != Lq:
        out = out[:, :Lq]
    return out


# ----------------------------------------------------------------------------
# Fused epilogues
# ----------------------------------------------------------------------------

def _proj_add_ln_kernel(a_ref, w_ref, b_ref, r_ref, g_ref, bb_ref, o_ref, *, eps):
    # LayerNorm(residual + attn @ Wo + bo)
    y = jnp.dot(a_ref[...], w_ref[...], preferred_element_type=jnp.float32)
    z = y + b_ref[...] + r_ref[...]
    mu = jnp.mean(z, axis=-1, keepdims=True)
    var = jnp.mean(jnp.square(z - mu), axis=-1, keepdims=True)
    zn = (z - mu) * jax.lax.rsqrt(var + eps)
    o_ref[...] = (zn * g_ref[...] + bb_ref[...]).astype(o_ref.dtype)


def out_proj_add_layernorm(attn, wo, bo, residual, gamma, beta, eps=1e-5):
    """attn: (B, L, D) bf16, residual: (B, L, D) f32 -> (B, L, D) f32."""
    B, L, D = attn.shape
    M = B * L
    tm = _pick_tile_m(M, _ROW_TILE)
    Mp = _round_up(M, tm)
    a2 = _pad_to(attn.reshape(M, D), 0, Mp)
    r2 = _pad_to(residual.reshape(M, D), 0, Mp)

    out = pl.pallas_call(
        functools.partial(_proj_add_ln_kernel, eps=eps),
        out_shape=jax.ShapeDtypeStruct((Mp, D), jnp.float32),
        grid=(Mp // tm,),
        in_specs=[
            pl.BlockSpec((tm, D), lambda i: (i, 0)),
            pl.BlockSpec((D, D), lambda i: (0, 0)),
            pl.BlockSpec((1, D), lambda i: (0, 0)),
            pl.BlockSpec((tm, D), lambda i: (i, 0)),
            pl.BlockSpec((1, D), lambda i: (0, 0)),
            pl.BlockSpec((1, D), lambda i: (0, 0)),
        ],
        out_specs=pl.BlockSpec((tm, D), lambda i: (i, 0)),
        compiler_params=_cparams(("parallel",)),
    )(a2, wo, bo, r2, gamma, beta)
    if Mp != M:
        out = out[:M]
    return out.reshape(B, L, D)


def _ffn_add_ln_kernel(x_ref, w1_ref, b1_ref, w2_ref, b2_ref,
                       g_ref, bb_ref, o_ref, acc_ref, *, eps):
    # LayerNorm(x + relu(x@W1+b1)@W2 + b2); Dff chunked on grid axis 1 so only
    # a (tm, tdff) hidden slab and (D, tdff)/(tdff, D) weight tiles are live.
    j = pl.program_id(1)

    @pl.when(j == 0)
    def _():
        acc_ref[...] = jnp.zeros_like(acc_ref)

    xb = x_ref[...].astype(jnp.bfloat16)
    h = jnp.dot(xb, w1_ref[...], preferred_element_type=jnp.float32) + b1_ref[...]
    h = jnp.maximum(h, 0.0)
    acc_ref[...] += jnp.dot(h.astype(jnp.bfloat16), w2_ref[...],
                            preferred_element_type=jnp.float32)

    @pl.when(j == pl.num_programs(1) - 1)
    def _():
        z = x_ref[...] + acc_ref[...] + b2_ref[...]
        mu = jnp.mean(z, axis=-1, keepdims=True)
        var = jnp.mean(jnp.square(z - mu), axis=-1, keepdims=True)
        zn = (z - mu) * jax.lax.rsqrt(var + eps)
        o_ref[...] = (zn * g_ref[...] + bb_ref[...]).astype(o_ref.dtype)


def ffn_add_layernorm(x, w1, b1, w2, b2, gamma, beta, eps=1e-5):
    """x: (B, L, D) f32 -> LayerNorm(x + FFN(x)); hidden activation never hits HBM."""
    B, L, D = x.shape
    Dff = w1.shape[1]
    M = B * L
    tm = _pick_tile_m(M, 256)
    tdff = _pick_tile_lane(Dff, _LANE_TILE)
    Mp, Dffp = _round_up(M, tm), _round_up(Dff, tdff)
    x2 = _pad_to(x.reshape(M, D), 0, Mp)
    w1p = _pad_to(w1, 1, Dffp)
    b1p = _pad_to(b1, 1, Dffp)
    w2p = _pad_to(w2, 0, Dffp)               # zero rows -> padded hidden units inert
    gm, gf = Mp // tm, Dffp // tdff

    cost = pl.CostEstimate(
        flops=4 * Mp * D * Dffp,
        transcendentals=0,
        bytes_accessed=(4 * Mp * D                       # x (resident across Dff axis)
                        + 2 * 2 * D * Dffp * gm           # bf16 W1 + W2 refetched per M tile
                        + 4 * (Dffp + 3 * D) * gm
                        + 4 * Mp * D),
    )

    out = pl.pallas_call(
        functools.partial(_ffn_add_ln_kernel, eps=eps),
        out_shape=jax.ShapeDtypeStruct((Mp, D), jnp.float32),
        grid=(gm, gf),
        in_specs=[
            pl.BlockSpec((tm, D), lambda i, j: (i, 0)),
            pl.BlockSpec((D, tdff), lambda i, j: (0, j)),
            pl.BlockSpec((1, tdff), lambda i, j: (0, j)),
            pl.BlockSpec((tdff, D), lambda i, j: (j, 0)),
            pl.BlockSpec((1, D), lambda i, j: (0, 0)),
            pl.BlockSpec((1, D), lambda i, j: (0, 0)),
            pl.BlockSpec((1, D), lambda i, j: (0, 0)),
        ],
        out_specs=pl.BlockSpec((tm, D), lambda i, j: (i, 0)),
        scratch_shapes=[pltpu.VMEM((tm, D), jnp.float32)],
        compiler_params=_cparams(("parallel", "arbitrary")),
        cost_estimate=cost,
    )(x2, w1p, b1p, w2p, b2, gamma, beta)
    if Mp != M:
        out = out[:M]
    return out.reshape(B, L, D)


# ----------------------------------------------------------------------------
# Parameters: raw f32 init (mirrors the PyTorch module) + one-time kernel prep
# ----------------------------------------------------------------------------

def _uniform(key, shape, fan_in):
    bound = 1.0 / math.sqrt(fan_in)
    return jax.random.uniform(key, shape, jnp.float32, -bound, bound)


def _init_mha(key, d_model):
    ks = jax.random.split(key, 4)
    z = jnp.zeros((d_model,), jnp.float32)
    return {"wq": _uniform(ks[0], (d_model, d_model), d_model),
            "wk": _uniform(ks[1], (d_model, d_model), d_model),
            "wv": _uniform(ks[2], (d_model, d_model), d_model),
            "wo": _uniform(ks[3], (d_model, d_model), d_model),
            "bq": z, "bk": z, "bv": z, "bo": z}


def init_params(key, map_feature_dim, d_model):
    ks = jax.random.split(key, 8)
    d_ff = 4 * d_model
    return {
        "map_embed_w": _uniform(ks[0], (map_feature_dim, d_model), map_feature_dim),
        "map_embed_b": _uniform(ks[1], (d_model,), map_feature_dim),
        "sa": _init_mha(ks[2], d_model),
        "ca": _init_mha(ks[3], d_model),
        "norm1_g": jnp.ones((d_model,), jnp.float32),
        "norm1_b": jnp.zeros((d_model,), jnp.float32),
        "norm2_g": jnp.ones((d_model,), jnp.float32),
        "norm2_b": jnp.zeros((d_model,), jnp.float32),
        "final_g": jnp.ones((d_model,), jnp.float32),
        "final_b": jnp.zeros((d_model,), jnp.float32),
        "ffn_w1": _uniform(ks[4], (d_model, d_ff), d_model),
        "ffn_b1": _uniform(ks[5], (d_ff,), d_model),
        "ffn_w2": _uniform(ks[6], (d_ff, d_model), d_ff),
        "ffn_b2": _uniform(ks[7], (d_model,), d_ff),
    }


def positional_encoding(seq_len, d_model):
    pos = jnp.arange(seq_len, dtype=jnp.float32)[:, None]
    div = jnp.exp(jnp.arange(0, d_model, 2, dtype=jnp.float32)
                  * (-math.log(10000.0) / d_model))
    pe = jnp.zeros((seq_len, d_model), dtype=jnp.float32)
    pe = pe.at[:, 0::2].set(jnp.sin(pos * div))
    pe = pe.at[:, 1::2].set(jnp.cos(pos * div))
    return pe


def prepare_params(raw, num_heads, n_map):
    """One-time weight prep (concat, 1/sqrt(hd) scale folding, bf16 cast,
    bias reshaping) so the jitted forward does zero per-call weight work."""
    d_model = raw["map_embed_w"].shape[1]
    assert d_model % num_heads == 0, "num_heads must divide d_model"
    scale = 1.0 / math.sqrt(d_model // num_heads)
    bf16, f32 = jnp.bfloat16, jnp.float32
    row = lambda b: b.reshape(1, -1).astype(f32)
    sa, ca = raw["sa"], raw["ca"]
    return {
        "emb_w": raw["map_embed_w"].astype(bf16)[None],                       # (1, F, D)
        "emb_b": raw["map_embed_b"].reshape(1, 1, -1).astype(f32),
        "pos_enc": positional_encoding(n_map, d_model),
        # self-attn: fused QKV groups, softmax scale folded into Wq / bq.
        "sa_w_qkv": jnp.stack([sa["wq"] * scale, sa["wk"], sa["wv"]]).astype(bf16),
        "sa_b_qkv": jnp.stack([sa["bq"] * scale, sa["bk"], sa["bv"]])[:, None, :].astype(f32),
        "sa_wo": sa["wo"].astype(bf16), "sa_bo": row(sa["bo"]),
        # cross-attn: Q alone (scale folded), fused KV groups.
        "ca_wq": (ca["wq"] * scale).astype(bf16)[None],
        "ca_bq": (ca["bq"] * scale).reshape(1, 1, -1).astype(f32),
        "ca_w_kv": jnp.stack([ca["wk"], ca["wv"]]).astype(bf16),
        "ca_b_kv": jnp.stack([ca["bk"], ca["bv"]])[:, None, :].astype(f32),
        "ca_wo": ca["wo"].astype(bf16), "ca_bo": row(ca["bo"]),
        "norm1_g": row(raw["norm1_g"]), "norm1_b": row(raw["norm1_b"]),
        "norm2_g": row(raw["norm2_g"]), "norm2_b": row(raw["norm2_b"]),
        "final_g": row(raw["final_g"]), "final_b": row(raw["final_b"]),
        "ffn_w1": raw["ffn_w1"].astype(bf16), "ffn_b1": row(raw["ffn_b1"]),
        "ffn_w2": raw["ffn_w2"].astype(bf16), "ffn_b2": row(raw["ffn_b2"]),
    }


# ----------------------------------------------------------------------------
# MapEncoder forward
# ----------------------------------------------------------------------------

def map_encoder_forward(params, map_features, traj_features, num_heads=4):
    B, T, N, D = traj_features.shape
    N_map = map_features.shape[1]
    assert D % num_heads == 0

    # map embedding + positional encoding (cheap XLA glue; dropout = identity)
    map_emb = grouped_linear(map_features, params["emb_w"], params["emb_b"],
                             out_dtype=jnp.float32)[0]
    map_emb = map_emb + params["pos_enc"][None]
    # TODO(synk): dropout in PositionalEncoding / FFN is identity (eval mode).

    # map self-attention: fused QKV -> attention -> fused out-proj+add+LN
    qkv = grouped_linear(map_emb, params["sa_w_qkv"], params["sa_b_qkv"])
    sa_out = attention(qkv, qkv, num_heads=num_heads,
                       q_group=0, k_group=1, v_group=2)
    map_enc = out_proj_add_layernorm(sa_out, params["sa_wo"], params["sa_bo"],
                                     map_emb, params["norm1_g"], params["norm1_b"])

    # trajectory <- map cross-attention: Q + fused KV -> attention -> epilogue
    traj = traj_features.reshape(B, T * N, D).astype(jnp.float32)
    q_ca = grouped_linear(traj, params["ca_wq"], params["ca_bq"])
    kv_ca = grouped_linear(map_enc, params["ca_w_kv"], params["ca_b_kv"])
    ca_out = attention(q_ca, kv_ca, num_heads=num_heads,
                       q_group=0, k_group=0, v_group=1)
    enhanced = out_proj_add_layernorm(ca_out, params["ca_wo"], params["ca_bo"],
                                      traj, params["norm2_g"], params["norm2_b"])

    # FFN (Dff chunked) + residual + final LayerNorm fused
    enhanced = ffn_add_layernorm(enhanced,
                                 params["ffn_w1"], params["ffn_b1"],
                                 params["ffn_w2"], params["ffn_b2"],
                                 params["final_g"], params["final_b"])
    return enhanced.reshape(B, T, N, D)


# ----------------------------------------------------------------------------
# Pure-JAX f32 reference (PyTorch semantics) for a tolerance check
# ----------------------------------------------------------------------------

def reference_forward(raw, map_features, traj_features, num_heads):
    def ln(x, g, b, eps=1e-5):
        mu = x.mean(-1, keepdims=True)
        var = ((x - mu) ** 2).mean(-1, keepdims=True)
        return (x - mu) / jnp.sqrt(var + eps) * g + b

    def mha(q_in, kv_in, p, h):
        B, Lq, D = q_in.shape
        Lk = kv_in.shape[1]
        hd = D // h
        q = (q_in @ p["wq"] + p["bq"]).reshape(B, Lq, h, hd).transpose(0, 2, 1, 3)
        k = (kv_in @ p["wk"] + p["bk"]).reshape(B, Lk, h, hd).transpose(0, 2, 1, 3)
        v = (kv_in @ p["wv"] + p["bv"]).reshape(B, Lk, h, hd).transpose(0, 2, 1, 3)
        s = jnp.einsum("bhqd,bhkd->bhqk", q, k) / math.sqrt(hd)
        a = jax.nn.softmax(s, axis=-1)
        o = jnp.einsum("bhqk,bhkd->bhqd", a, v).transpose(0, 2, 1, 3).reshape(B, Lq, D)
        return o @ p["wo"] + p["bo"]

    B, T, N, D = traj_features.shape
    n_map = map_features.shape[1]
    emb = map_features @ raw["map_embed_w"] + raw["map_embed_b"]
    emb = emb + positional_encoding(n_map, D)[None]
    emb = ln(emb + mha(emb, emb, raw["sa"], num_heads),
             raw["norm1_g"], raw["norm1_b"])
    traj = traj_features.reshape(B, T * N, D)
    enh = ln(traj + mha(traj, emb, raw["ca"], num_heads),
             raw["norm2_g"], raw["norm2_b"])
    ffn = jnp.maximum(enh @ raw["ffn_w1"] + raw["ffn_b1"], 0.0) @ raw["ffn_w2"] + raw["ffn_b2"]
    enh = ln(enh + ffn, raw["final_g"], raw["final_b"])
    return enh.reshape(B, T, N, D)


# ----------------------------------------------------------------------------
# Main
# ----------------------------------------------------------------------------

if __name__ == "__main__":
    B, T, N = 2, 4, 2
    N_map = 8
    map_feature_dim = 16
    d_model = 32            # D of traj_features must equal d_model
    num_heads = 4

    key = jax.random.PRNGKey(0)
    k_params, k_map, k_traj = jax.random.split(key, 3)

    raw_params = init_params(k_params, map_feature_dim, d_model)
    params = prepare_params(raw_params, num_heads, N_map)   # one-time weight prep

    map_features = jax.random.normal(k_map, (B, N_map, map_feature_dim),
                                     dtype=jnp.float32)
    traj_features = jax.random.normal(k_traj, (B, T, N, d_model),
                                      dtype=jnp.float32)

    fwd = jax.jit(functools.partial(map_encoder_forward, num_heads=num_heads))
    out = jax.block_until_ready(fwd(params, map_features, traj_features))

    assert out.shape == (B, T, N, d_model), out.shape
    assert bool(jnp.all(jnp.isfinite(out)))

    # f32 reference check; bf16 weights/activations + approx reciprocal give
    # ~1e-2-level deviations, so use a loose-but-meaningful tolerance.
    ref = reference_forward(raw_params, map_features, traj_features, num_heads)
    max_err = float(jnp.max(jnp.abs(out - ref)))
    assert max_err < 0.1, f"max abs err vs f32 reference: {max_err}"

    print("KERNEL_OK")
</pallas_src>

<mosaic_0001>
module attributes {stable_mosaic.version = 11 : i64} {
  func.func @_grouped_linear_kernel(%arg0: i32, %arg1: i32, %arg2: i32, %arg3: memref<8x32xf32, #tpu.memory_space<vmem>>, %arg4: memref<1x32x32xbf16, #tpu.memory_space<vmem>>, %arg5: memref<1x1x32xf32, #tpu.memory_space<vmem>>, %arg6: memref<1x8x32xbf16, #tpu.memory_space<vmem>>, %arg7: memref<8x32xf32, #tpu.memory_space<vmem>>) attributes {dimension_semantics = [#tpu.dimension_semantics<parallel>, #tpu.dimension_semantics<parallel>, #tpu.dimension_semantics<arbitrary>], iteration_bounds = array<i64: 2, 3, 1>, scalar_prefetch = 0 : i64, scratch_operands = 1 : i64, tpu.core_type = #tpu.core_type<tc>, window_params = [{transform_indices = @transform_0, window_bounds = array<i64: 8, 32>}, {transform_indices = @transform_1, window_bounds = array<i64: 1, 32, 32>}, {transform_indices = @transform_2, window_bounds = array<i64: 1, 1, 32>}, {transform_indices = @transform_3, window_bounds = array<i64: 1, 8, 32>}]} {
    %c0_i32 = arith.constant 0 : i32
    %0 = arith.cmpi eq, %arg2, %c0_i32 : i32
    %1 = arith.extui %0 : i1 to i32
    %c0_i32_0 = arith.constant 0 : i32
    %2 = arith.cmpi ne, %1, %c0_i32_0 : i32
    scf.if %2 {
      %cst_11 = arith.constant 0.000000e+00 : f32
      %14 = vector.broadcast %cst_11 : f32 to vector<8x32xf32>
      %c0_12 = arith.constant 0 : index
      %c0_13 = arith.constant 0 : index
      %15 = vector.load %arg7[%c0_12, %c0_13] : memref<8x32xf32, #tpu.memory_space<vmem>>, vector<8x32xf32>
      tpu.vector_store %arg7[%c0_12, %c0_13], %14 {strides = array<i32>} : memref<8x32xf32, #tpu.memory_space<vmem>>, vector<8x32xf32>,
    } else {
    }
    %c0 = arith.constant 0 : index
    %c0_1 = arith.constant 0 : index
    %3 = vector.load %arg7[%c0, %c0_1] : memref<8x32xf32, #tpu.memory_space<vmem>>, vector<8x32xf32>
    %c0_2 = arith.constant 0 : index
    %c0_3 = arith.constant 0 : index
    %4 = vector.load %arg3[%c0_2, %c0_3] : memref<8x32xf32, #tpu.memory_space<vmem>>, vector<8x32xf32>
    %5 = arith.truncf %4 : vector<8x32xf32> to vector<8x32xbf16>
    %c0_4 = arith.constant 0 : index
    %c0_5 = arith.constant 0 : index
    %c0_6 = arith.constant 0 : index
    %6 = vector.load %arg4[%c0_4, %c0_5, %c0_6] : memref<1x32x32xbf16, #tpu.memory_space<vmem>>, vector<1x32x32xbf16>
    %7 = vector.shape_cast %6 : vector<1x32x32xbf16> to vector<32x32xbf16>
    %cst = arith.constant dense<0.000000e+00> : vector<8x32xf32>
    %8 = tpu.matmul %5, %7, %cst {dimension_numbers = #tpu.dot_dimension_numbers<[1], [0], [0], [1], [0, 0, 1, 1], [], []>} : vector<8x32xbf16>, vector<32x32xbf16>, vector<8x32xf32> -> vector<8x32xf32>
    %9 = arith.addf %3, %8 : vector<8x32xf32>
    %c0_7 = arith.constant 0 : index
    %c0_8 = arith.constant 0 : index
    %10 = vector.load %arg7[%c0_7, %c0_8] : memref<8x32xf32, #tpu.memory_space<vmem>>, vector<8x32xf32>
    tpu.vector_store %arg7[%c0_7, %c0_8], %9 {strides = array<i32>} : memref<8x32xf32, #tpu.memory_space<vmem>>, vector<8x32xf32>,
    %c0_i32_9 = arith.constant 0 : i32
    %11 = arith.cmpi eq, %arg2, %c0_i32_9 : i32
    %12 = arith.extui %11 : i1 to i32
    %c0_i32_10 = arith.constant 0 : i32
    %13 = arith.cmpi ne, %12, %c0_i32_10 : i32
    scf.if %13 {
      %c0_11 = arith.constant 0 : index
      %c0_12 = arith.constant 0 : index
      %14 = vector.load %arg7[%c0_11, %c0_12] : memref<8x32xf32, #tpu.memory_space<vmem>>, vector<8x32xf32>
      %c0_13 = arith.constant 0 : index
      %c0_14 = arith.constant 0 : index
      %c0_15 = arith.constant 0 : index
      %15 = vector.load %arg5[%c0_13, %c0_14, %c0_15] : memref<1x1x32xf32, #tpu.memory_space<vmem>>, vector<1x1x32xf32>
      %16 = vector.shape_cast %15 : vector<1x1x32xf32> to vector<1x32xf32>
      %17 = vector.broadcast %16 : vector<1x32xf32> to vector<8x32xf32>
      %18 = arith.addf %14, %17 : vector<8x32xf32>
      %19 = arith.truncf %18 : vector<8x32xf32> to vector<8x32xbf16>
      %c0_16 = arith.constant 0 : index
      %c0_17 = arith.constant 0 : index
      %c0_18 = arith.constant 0 : index
      %20 = vector.load %arg6[%c0_16, %c0_17, %c0_18] : memref<1x8x32xbf16, #tpu.memory_space<vmem>>, vector<1x8x32xbf16>
      %21 = vector.shape_cast %20 : vector<1x8x32xbf16> to vector<8x32xbf16>
      %22 = vector.shape_cast %19 : vector<8x32xbf16> to vector<1x8x32xbf16>
      tpu.vector_store %arg6[%c0_16, %c0_17, %c0_18], %22 {strides = array<i32>} : memref<1x8x32xbf16, #tpu.memory_space<vmem>>, vector<1x8x32xbf16>,
    } else {
    }
    return
  }
  func.func @transform_0(%arg0: i32, %arg1: i32, %arg2: i32) -> (i32, i32) {
    %c0_i32 = arith.constant 0 : i32
    return %arg0, %arg2 : i32, i32
  }
  func.func @transform_1(%arg0: i32, %arg1: i32, %arg2: i32) -> (i32, i32, i32) {
    %c0_i32 = arith.constant 0 : i32
    %c0_i32_0 = arith.constant 0 : i32
    return %arg1, %arg2, %c0_i32 : i32, i32, i32
  }
  func.func @transform_2(%arg0: i32, %arg1: i32, %arg2: i32) -> (i32, i32, i32) {
    %c0_i32 = arith.constant 0 : i32
    %c0_i32_0 = arith.constant 0 : i32
    %c0_i32_1 = arith.constant 0 : i32
    return %arg1, %c0_i32, %c0_i32_0 : i32, i32, i32
  }
  func.func @transform_3(%arg0: i32, %arg1: i32, %arg2: i32) -> (i32, i32, i32) {
    %c0_i32 = arith.constant 0 : i32
    %c0_i32_0 = arith.constant 0 : i32
    return %arg1, %arg0, %c0_i32 : i32, i32, i32
  }
}

module attributes {stable_mosaic.version = 11 : i64} {
  func.func @_grouped_linear_kernel(%arg0: i32, %arg1: i32, %arg2: i32, %arg3: memref<8x16xf32, #tpu.memory_space<vmem>>, %arg4: memref<1x16x32xbf16, #tpu.memory_space<vmem>>, %arg5: memref<1x1x32xf32, #tpu.memory_space<vmem>>, %arg6: memref<1x8x32xf32, #tpu.memory_space<vmem>>, %arg7: memref<8x32xf32, #tpu.memory_space<vmem>>) attributes {dimension_semantics = [#tpu.dimension_semantics<parallel>, #tpu.dimension_semantics<parallel>, #tpu.dimension_semantics<arbitrary>], iteration_bounds = array<i64: 2, 1, 1>, scalar_prefetch = 0 : i64, scratch_operands = 1 : i64, tpu.core_type = #tpu.core_type<tc>, window_params = [{transform_indices = @transform_0, window_bounds = array<i64: 8, 16>}, {transform_indices = @transform_1, window_bounds = array<i64: 1, 16, 32>}, {transform_indices = @transform_2, window_bounds = array<i64: 1, 1, 32>}, {transform_indices = @transform_3, window_bounds = array<i64: 1, 8, 32>}]} {
    %c0_i32 = arith.constant 0 : i32
    %0 = arith.cmpi eq, %arg2, %c0_i32 : i32
    %1 = arith.extui %0 : i1 to i32
    %c0_i32_0 = arith.constant 0 : i32
    %2 = arith.cmpi ne, %1, %c0_i32_0 : i32
    scf.if %2 {
      %cst_11 = arith.constant 0.000000e+00 : f32
      %14 = vector.broadcast %cst_11 : f32 to vector<8x32xf32>
      %c0_12 = arith.constant 0 : index
      %c0_13 = arith.constant 0 : index
      %15 = vector.load %arg7[%c0_12, %c0_13] : memref<8x32xf32, #tpu.memory_space<vmem>>, vector<8x32xf32>
      tpu.vector_store %arg7[%c0_12, %c0_13], %14 {strides = array<i32>} : memref<8x32xf32, #tpu.memory_space<vmem>>, vector<8x32xf32>,
    } else {
    }
    %c0 = arith.constant 0 : index
    %c0_1 = arith.constant 0 : index
    %3 = vector.load %arg7[%c0, %c0_1] : memref<8x32xf32, #tpu.memory_space<vmem>>, vector<8x32xf32>
    %c0_2 = arith.constant 0 : index
    %c0_3 = arith.constant 0 : index
    %4 = vector.load %arg3[%c0_2, %c0_3] : memref<8x16xf32, #tpu.memory_space<vmem>>, vector<8x16xf32>
    %5 = arith.truncf %4 : vector<8x16xf32> to vector<8x16xbf16>
    %c0_4 = arith.constant 0 : index
    %c0_5 = arith.constant 0 : index
    %c0_6 = arith.constant 0 : index
    %6 = vector.load %arg4[%c0_4, %c0_5, %c0_6] : memref<1x16x32xbf16, #tpu.memory_space<vmem>>, vector<1x16x32xbf16>
    %7 = vector.shape_cast %6 : vector<1x16x32xbf16> to vector<16x32xbf16>
    %cst = arith.constant dense<0.000000e+00> : vector<8x32xf32>
    %8 = tpu.matmul %5, %7, %cst {dimension_numbers = #tpu.dot_dimension_numbers<[1], [0], [0], [1], [0, 0, 1, 1], [], []>} : vector<8x16xbf16>, vector<16x32xbf16>, vector<8x32xf32> -> vector<8x32xf32>
    %9 = arith.addf %3, %8 : vector<8x32xf32>
    %c0_7 = arith.constant 0 : index
    %c0_8 = arith.constant 0 : index
    %10 = vector.load %arg7[%c0_7, %c0_8] : memref<8x32xf32, #tpu.memory_space<vmem>>, vector<8x32xf32>
    tpu.vector_store %arg7[%c0_7, %c0_8], %9 {strides = array<i32>} : memref<8x32xf32, #tpu.memory_space<vmem>>, vector<8x32xf32>,
    %c0_i32_9 = arith.constant 0 : i32
    %11 = arith.cmpi eq, %arg2, %c0_i32_9 : i32
    %12 = arith.extui %11 : i1 to i32
    %c0_i32_10 = arith.constant 0 : i32
    %13 = arith.cmpi ne, %12, %c0_i32_10 : i32
    scf.if %13 {
      %c0_11 = arith.constant 0 : index
      %c0_12 = arith.constant 0 : index
      %14 = vector.load %arg7[%c0_11, %c0_12] : memref<8x32xf32, #tpu.memory_space<vmem>>, vector<8x32xf32>
      %c0_13 = arith.constant 0 : index
      %c0_14 = arith.constant 0 : index
      %c0_15 = arith.constant 0 : index
      %15 = vector.load %arg5[%c0_13, %c0_14, %c0_15] : memref<1x1x32xf32, #tpu.memory_space<vmem>>, vector<1x1x32xf32>
      %16 = vector.shape_cast %15 : vector<1x1x32xf32> to vector<1x32xf32>
      %17 = vector.broadcast %16 : vector<1x32xf32> to vector<8x32xf32>
      %18 = arith.addf %14, %17 : vector<8x32xf32>
      %c0_16 = arith.constant 0 : index
      %c0_17 = arith.constant 0 : index
      %c0_18 = arith.constant 0 : index
      %19 = vector.load %arg6[%c0_16, %c0_17, %c0_18] : memref<1x8x32xf32, #tpu.memory_space<vmem>>, vector<1x8x32xf32>
      %20 = vector.shape_cast %19 : vector<1x8x32xf32> to vector<8x32xf32>
      %21 = vector.shape_cast %18 : vector<8x32xf32> to vector<1x8x32xf32>
      tpu.vector_store %arg6[%c0_16, %c0_17, %c0_18], %21 {strides = array<i32>} : memref<1x8x32xf32, #tpu.memory_space<vmem>>, vector<1x8x32xf32>,
    } else {
    }
    return
  }
  func.func @transform_0(%arg0: i32, %arg1: i32, %arg2: i32) -> (i32, i32) {
    %c0_i32 = arith.constant 0 : i32
    return %arg0, %arg2 : i32, i32
  }
  func.func @transform_1(%arg0: i32, %arg1: i32, %arg2: i32) -> (i32, i32, i32) {
    %c0_i32 = arith.constant 0 : i32
    %c0_i32_0 = arith.constant 0 : i32
    return %arg1, %arg2, %c0_i32 : i32, i32, i32
  }
  func.func @transform_2(%arg0: i32, %arg1: i32, %arg2: i32) -> (i32, i32, i32) {
    %c0_i32 = arith.constant 0 : i32
    %c0_i32_0 = arith.constant 0 : i32
    %c0_i32_1 = arith.constant 0 : i32
    return %arg1, %c0_i32, %c0_i32_0 : i32, i32, i32
  }
  func.func @transform_3(%arg0: i32, %arg1: i32, %arg2: i32) -> (i32, i32, i32) {
    %c0_i32 = arith.constant 0 : i32
    %c0_i32_0 = arith.constant 0 : i32
    return %arg1, %arg0, %c0_i32 : i32, i32, i32
  }
}

module attributes {stable_mosaic.version = 11 : i64} {
  func.func @_grouped_linear_kernel(%arg0: i32, %arg1: i32, %arg2: i32, %arg3: memref<8x32xf32, #tpu.memory_space<vmem>>, %arg4: memref<1x32x32xbf16, #tpu.memory_space<vmem>>, %arg5: memref<1x1x32xf32, #tpu.memory_space<vmem>>, %arg6: memref<1x8x32xbf16, #tpu.memory_space<vmem>>, %arg7: memref<8x32xf32, #tpu.memory_space<vmem>>) attributes {dimension_semantics = [#tpu.dimension_semantics<parallel>, #tpu.dimension_semantics<parallel>, #tpu.dimension_semantics<arbitrary>], iteration_bounds = array<i64: 2, 1, 1>, scalar_prefetch = 0 : i64, scratch_operands = 1 : i64, tpu.core_type = #tpu.core_type<tc>, window_params = [{transform_indices = @transform_0, window_bounds = array<i64: 8, 32>}, {transform_indices = @transform_1, window_bounds = array<i64: 1, 32, 32>}, {transform_indices = @transform_2, window_bounds = array<i64: 1, 1, 32>}, {transform_indices = @transform_3, window_bounds = array<i64: 1, 8, 32>}]} {
    %c0_i32 = arith.constant 0 : i32
    %0 = arith.cmpi eq, %arg2, %c0_i32 : i32
    %1 = arith.extui %0 : i1 to i32
    %c0_i32_0 = arith.constant 0 : i32
    %2 = arith.cmpi ne, %1, %c0_i32_0 : i32
    scf.if %2 {
      %cst_11 = arith.constant 0.000000e+00 : f32
      %14 = vector.broadcast %cst_11 : f32 to vector<8x32xf32>
      %c0_12 = arith.constant 0 : index
      %c0_13 = arith.constant 0 : index
      %15 = vector.load %arg7[%c0_12, %c0_13] : memref<8x32xf32, #tpu.memory_space<vmem>>, vector<8x32xf32>
      tpu.vector_store %arg7[%c0_12, %c0_13], %14 {strides = array<i32>} : memref<8x32xf32, #tpu.memory_space<vmem>>, vector<8x32xf32>,
    } else {
    }
    %c0 = arith.constant 0 : index
    %c0_1 = arith.constant 0 : index
    %3 = vector.load %arg7[%c0, %c0_1] : memref<8x32xf32, #tpu.memory_space<vmem>>, vector<8x32xf32>
    %c0_2 = arith.constant 0 : index
    %c0_3 = arith.constant 0 : index
    %4 = vector.load %arg3[%c0_2, %c0_3] : memref<8x32xf32, #tpu.memory_space<vmem>>, vector<8x32xf32>
    %5 = arith.truncf %4 : vector<8x32xf32> to vector<8x32xbf16>
    %c0_4 = arith.constant 0 : index
    %c0_5 = arith.constant 0 : index
    %c0_6 = arith.constant 0 : index
    %6 = vector.load %arg4[%c0_4, %c0_5, %c0_6] : memref<1x32x32xbf16, #tpu.memory_space<vmem>>, vector<1x32x32xbf16>
    %7 = vector.shape_cast %6 : vector<1x32x32xbf16> to vector<32x32xbf16>
    %cst = arith.constant dense<0.000000e+00> : vector<8x32xf32>
    %8 = tpu.matmul %5, %7, %cst {dimension_numbers = #tpu.dot_dimension_numbers<[1], [0], [0], [1], [0, 0, 1, 1], [], []>} : vector<8x32xbf16>, vector<32x32xbf16>, vector<8x32xf32> -> vector<8x32xf32>
    %9 = arith.addf %3, %8 : vector<8x32xf32>
    %c0_7 = arith.constant 0 : index
    %c0_8 = arith.constant 0 : index
    %10 = vector.load %arg7[%c0_7, %c0_8] : memref<8x32xf32, #tpu.memory_space<vmem>>, vector<8x32xf32>
    tpu.vector_store %arg7[%c0_7, %c0_8], %9 {strides = array<i32>} : memref<8x32xf32, #tpu.memory_space<vmem>>, vector<8x32xf32>,
    %c0_i32_9 = arith.constant 0 : i32
    %11 = arith.cmpi eq, %arg2, %c0_i32_9 : i32
    %12 = arith.extui %11 : i1 to i32
    %c0_i32_10 = arith.constant 0 : i32
    %13 = arith.cmpi ne, %12, %c0_i32_10 : i32
    scf.if %13 {
      %c0_11 = arith.constant 0 : index
      %c0_12 = arith.constant 0 : index
      %14 = vector.load %arg7[%c0_11, %c0_12] : memref<8x32xf32, #tpu.memory_space<vmem>>, vector<8x32xf32>
      %c0_13 = arith.constant 0 : index
      %c0_14 = arith.constant 0 : index
      %c0_15 = arith.constant 0 : index
      %15 = vector.load %arg5[%c0_13, %c0_14, %c0_15] : memref<1x1x32xf32, #tpu.memory_space<vmem>>, vector<1x1x32xf32>
      %16 = vector.shape_cast %15 : vector<1x1x32xf32> to vector<1x32xf32>
      %17 = vector.broadcast %16 : vector<1x32xf32> to vector<8x32xf32>
      %18 = arith.addf %14, %17 : vector<8x32xf32>
      %19 = arith.truncf %18 : vector<8x32xf32> to vector<8x32xbf16>
      %c0_16 = arith.constant 0 : index
      %c0_17 = arith.constant 0 : index
      %c0_18 = arith.constant 0 : index
      %20 = vector.load %arg6[%c0_16, %c0_17, %c0_18] : memref<1x8x32xbf16, #tpu.memory_space<vmem>>, vector<1x8x32xbf16>
      %21 = vector.shape_cast %20 : vector<1x8x32xbf16> to vector<8x32xbf16>
      %22 = vector.shape_cast %19 : vector<8x32xbf16> to vector<1x8x32xbf16>
      tpu.vector_store %arg6[%c0_16, %c0_17, %c0_18], %22 {strides = array<i32>} : memref<1x8x32xbf16, #tpu.memory_space<vmem>>, vector<1x8x32xbf16>,
    } else {
    }
    return
  }
  func.func @transform_0(%arg0: i32, %arg1: i32, %arg2: i32) -> (i32, i32) {
    %c0_i32 = arith.constant 0 : i32
    return %arg0, %arg2 : i32, i32
  }
  func.func @transform_1(%arg0: i32, %arg1: i32, %arg2: i32) -> (i32, i32, i32) {
    %c0_i32 = arith.constant 0 : i32
    %c0_i32_0 = arith.constant 0 : i32
    return %arg1, %arg2, %c0_i32 : i32, i32, i32
  }
  func.func @transform_2(%arg0: i32, %arg1: i32, %arg2: i32) -> (i32, i32, i32) {
    %c0_i32 = arith.constant 0 : i32
    %c0_i32_0 = arith.constant 0 : i32
    %c0_i32_1 = arith.constant 0 : i32
    return %arg1, %c0_i32, %c0_i32_0 : i32, i32, i32
  }
  func.func @transform_3(%arg0: i32, %arg1: i32, %arg2: i32) -> (i32, i32, i32) {
    %c0_i32 = arith.constant 0 : i32
    %c0_i32_0 = arith.constant 0 : i32
    return %arg1, %arg0, %c0_i32 : i32, i32, i32
  }
}

module attributes {stable_mosaic.version = 11 : i64} {
  func.func @_attn_kernel(%arg0: i32, %arg1: i32, %arg2: memref<1x1x8x32xbf16, #tpu.memory_space<vmem>>, %arg3: memref<1x1x8x32xbf16, #tpu.memory_space<vmem>>, %arg4: memref<1x1x8x32xbf16, #tpu.memory_space<vmem>>, %arg5: memref<1x8x32xbf16, #tpu.memory_space<vmem>>) attributes {dimension_semantics = [#tpu.dimension_semantics<parallel>, #tpu.dimension_semantics<parallel>], iteration_bounds = array<i64: 2, 1>, scalar_prefetch = 0 : i64, scratch_operands = 0 : i64, tpu.core_type = #tpu.core_type<tc>, window_params = [{transform_indices = @transform_0, window_bounds = array<i64: 1, 1, 8, 32>}, {transform_indices = @transform_1, window_bounds = array<i64: 1, 1, 8, 32>}, {transform_indices = @transform_2, window_bounds = array<i64: 1, 1, 8, 32>}, {transform_indices = @transform_3, window_bounds = array<i64: 1, 8, 32>}]} {
    %c0 = arith.constant 0 : index
    %c0_0 = arith.constant 0 : index
    %c0_1 = arith.constant 0 : index
    %c0_2 = arith.constant 0 : index
    %0 = vector.load %arg2[%c0, %c0_0, %c0_1, %c0_2] : memref<1x1x8x32xbf16, #tpu.memory_space<vmem>>, vector<1x1x8x32xbf16>
    %1 = vector.shape_cast %0 : vector<1x1x8x32xbf16> to vector<8x32xbf16>
    %c0_3 = arith.constant 0 : index
    %c0_4 = arith.constant 0 : index
    %c0_5 = arith.constant 0 : index
    %c0_6 = arith.constant 0 : index
    %2 = vector.load %arg3[%c0_3, %c0_4, %c0_5, %c0_6] : memref<1x1x8x32xbf16, #tpu.memory_space<vmem>>, vector<1x1x8x32xbf16>
    %3 = vector.shape_cast %2 : vector<1x1x8x32xbf16> to vector<8x32xbf16>
    %c0_7 = arith.constant 0 : index
    %c0_8 = arith.constant 0 : index
    %c0_9 = arith.constant 0 : index
    %c0_10 = arith.constant 0 : index
    %4 = vector.load %arg4[%c0_7, %c0_8, %c0_9, %c0_10] : memref<1x1x8x32xbf16, #tpu.memory_space<vmem>>, vector<1x1x8x32xbf16>
    %5 = vector.shape_cast %4 : vector<1x1x8x32xbf16> to vector<8x32xbf16>
    %6 = vector.extract_strided_slice %1 {offsets = [0, 0], sizes = [8, 8], strides = [1, 1]} : vector<8x32xbf16> to vector<8x8xbf16>
    %7 = vector.extract_strided_slice %3 {offsets = [0, 0], sizes = [8, 8], strides = [1, 1]} : vector<8x32xbf16> to vector<8x8xbf16>
    %cst = arith.constant dense<0.000000e+00> : vector<8x8xf32>
    %8 = tpu.matmul %6, %7, %cst {dimension_numbers = #tpu.dot_dimension_numbers<[1], [1], [0], [0], [0, 0, 1, 0], [], []>} : vector<8x8xbf16>, vector<8x8xbf16>, vector<8x8xf32> -> vector<8x8xf32>
    %cst_11 = arith.constant dense<0xFF800000> : vector<8xf32>
    %9 = vector.multi_reduction <maximumf>, %8, %cst_11 [1] : vector<8x8xf32> to vector<8xf32>
    %10 = vector.shape_cast %9 : vector<8xf32> to vector<8x1xf32>
    %11 = vector.broadcast %10 : vector<8x1xf32> to vector<8x8xf32>
    %12 = arith.subf %8, %11 : vector<8x8xf32>
    %13 = math.exp %12 : vector<8x8xf32>
    %cst_12 = arith.constant dense<0.000000e+00> : vector<8xf32>
    %14 = vector.multi_reduction <add>, %13, %cst_12 [1] : vector<8x8xf32> to vector<8xf32>
    %15 = vector.shape_cast %14 : vector<8xf32> to vector<8x1xf32>
    %16 = arith.truncf %13 : vector<8x8xf32> to vector<8x8xbf16>
    %17 = vector.extract_strided_slice %5 {offsets = [0, 0], sizes = [8, 8], strides = [1, 1]} : vector<8x32xbf16> to vector<8x8xbf16>
    %cst_13 = arith.constant dense<0.000000e+00> : vector<8x8xf32>
    %18 = tpu.matmul %16, %17, %cst_13 {dimension_numbers = #tpu.dot_dimension_numbers<[1], [0], [0], [1], [0, 0, 1, 1], [], []>} : vector<8x8xbf16>, vector<8x8xbf16>, vector<8x8xf32> -> vector<8x8xf32>
    %19 = tpu.reciprocal %15 {approx = true} : vector<8x1xf32> -> vector<8x1xf32>
    %20 = vector.broadcast %19 : vector<8x1xf32> to vector<8x8xf32>
    %21 = arith.mulf %18, %20 : vector<8x8xf32>
    %22 = vector.extract_strided_slice %1 {offsets = [0, 8], sizes = [8, 8], strides = [1, 1]} : vector<8x32xbf16> to vector<8x8xbf16>
    %23 = vector.extract_strided_slice %3 {offsets = [0, 8], sizes = [8, 8], strides = [1, 1]} : vector<8x32xbf16> to vector<8x8xbf16>
    %cst_14 = arith.constant dense<0.000000e+00> : vector<8x8xf32>
    %24 = tpu.matmul %22, %23, %cst_14 {dimension_numbers = #tpu.dot_dimension_numbers<[1], [1], [0], [0], [0, 0, 1, 0], [], []>} : vector<8x8xbf16>, vector<8x8xbf16>, vector<8x8xf32> -> vector<8x8xf32>
    %cst_15 = arith.constant dense<0xFF800000> : vector<8xf32>
    %25 = vector.multi_reduction <maximumf>, %24, %cst_15 [1] : vector<8x8xf32> to vector<8xf32>
    %26 = vector.shape_cast %25 : vector<8xf32> to vector<8x1xf32>
    %27 = vector.broadcast %26 : vector<8x1xf32> to vector<8x8xf32>
    %28 = arith.subf %24, %27 : vector<8x8xf32>
    %29 = math.exp %28 : vector<8x8xf32>
    %cst_16 = arith.constant dense<0.000000e+00> : vector<8xf32>
    %30 = vector.multi_reduction <add>, %29, %cst_16 [1] : vector<8x8xf32> to vector<8xf32>
    %31 = vector.shape_cast %30 : vector<8xf32> to vector<8x1xf32>
    %32 = arith.truncf %29 : vector<8x8xf32> to vector<8x8xbf16>
    %33 = vector.extract_strided_slice %5 {offsets = [0, 8], sizes = [8, 8], strides = [1, 1]} : vector<8x32xbf16> to vector<8x8xbf16>
    %cst_17 = arith.constant dense<0.000000e+00> : vector<8x8xf32>
    %34 = tpu.matmul %32, %33, %cst_17 {dimension_numbers = #tpu.dot_dimension_numbers<[1], [0], [0], [1], [0, 0, 1, 1], [], []>} : vector<8x8xbf16>, vector<8x8xbf16>, vector<8x8xf32> -> vector<8x8xf32>
    %35 = tpu.reciprocal %31 {approx = true} : vector<8x1xf32> -> vector<8x1xf32>
    %36 = vector.broadcast %35 : vector<8x1xf32> to vector<8x8xf32>
    %37 = arith.mulf %34, %36 : vector<8x8xf32>
    %38 = vector.extract_strided_slice %1 {offsets = [0, 16], sizes = [8, 8], strides = [1, 1]} : vector<8x32xbf16> to vector<8x8xbf16>
    %39 = vector.extract_strided_slice %3 {offsets = [0, 16], sizes = [8, 8], strides = [1, 1]} : vector<8x32xbf16> to vector<8x8xbf16>
    %cst_18 = arith.constant dense<0.000000e+00> : vector<8x8xf32>
    %40 = tpu.matmul %38, %39, %cst_18 {dimension_numbers = #tpu.dot_dimension_numbers<[1], [1], [0], [0], [0, 0, 1, 0], [], []>} : vector<8x8xbf16>, vector<8x8xbf16>, vector<8x8xf32> -> vector<8x8xf32>
    %cst_19 = arith.constant dense<0xFF800000> : vector<8xf32>
    %41 = vector.multi_reduction <maximumf>, %40, %cst_19 [1] : vector<8x8xf32> to vector<8xf32>
    %42 = vector.shape_cast %41 : vector<8xf32> to vector<8x1xf32>
    %43 = vector.broadcast %42 : vector<8x1xf32> to vector<8x8xf32>
    %44 = arith.subf %40, %43 : vector<8x8xf32>
    %45 = math.exp %44 : vector<8x8xf32>
    %cst_20 = arith.constant dense<0.000000e+00> : vector<8xf32>
    %46 = vector.multi_reduction <add>, %45, %cst_20 [1] : vector<8x8xf32> to vector<8xf32>
    %47 = vector.shape_cast %46 : vector<8xf32> to vector<8x1xf32>
    %48 = arith.truncf %45 : vector<8x8xf32> to vector<8x8xbf16>
    %49 = vector.extract_strided_slice %5 {offsets = [0, 16], sizes = [8, 8], strides = [1, 1]} : vector<8x32xbf16> to vector<8x8xbf16>
    %cst_21 = arith.constant dense<0.000000e+00> : vector<8x8xf32>
    %50 = tpu.matmul %48, %49, %cst_21 {dimension_numbers = #tpu.dot_dimension_numbers<[1], [0], [0], [1], [0, 0, 1, 1], [], []>} : vector<8x8xbf16>, vector<8x8xbf16>, vector<8x8xf32> -> vector<8x8xf32>
    %51 = tpu.reciprocal %47 {approx = true} : vector<8x1xf32> -> vector<8x1xf32>
    %52 = vector.broadcast %51 : vector<8x1xf32> to vector<8x8xf32>
    %53 = arith.mulf %50, %52 : vector<8x8xf32>
    %54 = vector.extract_strided_slice %1 {offsets = [0, 24], sizes = [8, 8], strides = [1, 1]} : vector<8x32xbf16> to vector<8x8xbf16>
    %55 = vector.extract_strided_slice %3 {offsets = [0, 24], sizes = [8, 8], strides = [1, 1]} : vector<8x32xbf16> to vector<8x8xbf16>
    %cst_22 = arith.constant dense<0.000000e+00> : vector<8x8xf32>
    %56 = tpu.matmul %54, %55, %cst_22 {dimension_numbers = #tpu.dot_dimension_numbers<[1], [1], [0], [0], [0, 0, 1, 0], [], []>} : vector<8x8xbf16>, vector<8x8xbf16>, vector<8x8xf32> -> vector<8x8xf32>
    %cst_23 = arith.constant dense<0xFF800000> : vector<8xf32>
    %57 = vector.multi_reduction <maximumf>, %56, %cst_23 [1] : vector<8x8xf32> to vector<8xf32>
    %58 = vector.shape_cast %57 : vector<8xf32> to vector<8x1xf32>
    %59 = vector.broadcast %58 : vector<8x1xf32> to vector<8x8xf32>
    %60 = arith.subf %56, %59 : vector<8x8xf32>
    %61 = math.exp %60 : vector<8x8xf32>
    %cst_24 = arith.constant dense<0.000000e+00> : vector<8xf32>
    %62 = vector.multi_reduction <add>, %61, %cst_24 [1] : vector<8x8xf32> to vector<8xf32>
    %63 = vector.shape_cast %62 : vector<8xf32> to vector<8x1xf32>
    %64 = arith.truncf %61 : vector<8x8xf32> to vector<8x8xbf16>
    %65 = vector.extract_strided_slice %5 {offsets = [0, 24], sizes = [8, 8], strides = [1, 1]} : vector<8x32xbf16> to vector<8x8xbf16>
    %cst_25 = arith.constant dense<0.000000e+00> : vector<8x8xf32>
    %66 = tpu.matmul %64, %65, %cst_25 {dimension_numbers = #tpu.dot_dimension_numbers<[1], [0], [0], [1], [0, 0, 1, 1], [], []>} : vector<8x8xbf16>, vector<8x8xbf16>, vector<8x8xf32> -> vector<8x8xf32>
    %67 = tpu.reciprocal %63 {approx = true} : vector<8x1xf32> -> vector<8x1xf32>
    %68 = vector.broadcast %67 : vector<8x1xf32> to vector<8x8xf32>
    %69 = arith.mulf %66, %68 : vector<8x8xf32>
    %70 = tpu.concatenate %21, %37, %53, %69 in 1 : vector<8x8xf32>, vector<8x8xf32>, vector<8x8xf32>, vector<8x8xf32> -> vector<8x32xf32>
    %71 = arith.truncf %70 : vector<8x32xf32> to vector<8x32xbf16>
    %c0_26 = arith.constant 0 : index
    %c0_27 = arith.constant 0 : index
    %c0_28 = arith.constant 0 : index
    %72 = vector.load %arg5[%c0_26, %c0_27, %c0_28] : memref<1x8x32xbf16, #tpu.memory_space<vmem>>, vector<1x8x32xbf16>
    %73 = vector.shape_cast %72 : vector<1x8x32xbf16> to vector<8x32xbf16>
    %74 = vector.shape_cast %71 : vector<8x32xbf16> to vector<1x8x32xbf16>
    tpu.vector_store %arg5[%c0_26, %c0_27, %c0_28], %74 {strides = array<i32>} : memref<1x8x32xbf16, #tpu.memory_space<vmem>>, vector<1x8x32xbf16>,
    return
  }
  func.func @transform_0(%arg0: i32, %arg1: i32) -> (i32, i32, i32, i32) {
    %c0_i32 = arith.constant 0 : i32
    %c0_i32_0 = arith.constant 0 : i32
    %c0_i32_1 = arith.constant 0 : i32
    return %c0_i32, %arg0, %arg1, %c0_i32_0 : i32, i32, i32, i32
  }
  func.func @transform_1(%arg0: i32, %arg1: i32) -> (i32, i32, i32, i32) {
    %c1_i32 = arith.constant 1 : i32
    %c0_i32 = arith.constant 0 : i32
    %c0_i32_0 = arith.constant 0 : i32
    %c0_i32_1 = arith.constant 0 : i32
    return %c1_i32, %arg0, %c0_i32, %c0_i32_0 : i32, i32, i32, i32
  }
  func.func @transform_2(%arg0: i32, %arg1: i32) -> (i32, i32, i32, i32) {
    %c2_i32 = arith.constant 2 : i32
    %c0_i32 = arith.constant 0 : i32
    %c0_i32_0 = arith.constant 0 : i32
    %c0_i32_1 = arith.constant 0 : i32
    return %c2_i32, %arg0, %c0_i32, %c0_i32_0 : i32, i32, i32, i32
  }
  func.func @transform_3(%arg0: i32, %arg1: i32) -> (i32, i32, i32) {
    %c0_i32 = arith.constant 0 : i32
    %c0_i32_0 = arith.constant 0 : i32
    return %arg0, %arg1, %c0_i32 : i32, i32, i32
  }
}

module attributes {stable_mosaic.version = 11 : i64} {
  func.func @_proj_add_ln_kernel(%arg0: i32, %arg1: memref<8x32xbf16, #tpu.memory_space<vmem>>, %arg2: memref<32x32xbf16, #tpu.memory_space<vmem>>, %arg3: memref<1x32xf32, #tpu.memory_space<vmem>>, %arg4: memref<8x32xf32, #tpu.memory_space<vmem>>, %arg5: memref<1x32xf32, #tpu.memory_space<vmem>>, %arg6: memref<1x32xf32, #tpu.memory_space<vmem>>, %arg7: memref<8x32xf32, #tpu.memory_space<vmem>>) attributes {dimension_semantics = [#tpu.dimension_semantics<parallel>], iteration_bounds = array<i64: 2>, scalar_prefetch = 0 : i64, scratch_operands = 0 : i64, tpu.core_type = #tpu.core_type<tc>, window_params = [{transform_indices = @transform_0, window_bounds = array<i64: 8, 32>}, {pipeline_mode = #tpu.pipeline_mode<synchronous>, transform_indices = @transform_1, window_bounds = array<i64: 32, 32>}, {pipeline_mode = #tpu.pipeline_mode<synchronous>, transform_indices = @transform_2, window_bounds = array<i64: 1, 32>}, {transform_indices = @transform_3, window_bounds = array<i64: 8, 32>}, {pipeline_mode = #tpu.pipeline_mode<synchronous>, transform_indices = @transform_4, window_bounds = array<i64: 1, 32>}, {pipeline_mode = #tpu.pipeline_mode<synchronous>, transform_indices = @transform_5, window_bounds = array<i64: 1, 32>}, {transform_indices = @transform_6, window_bounds = array<i64: 8, 32>}]} {
    %c0 = arith.constant 0 : index
    %c0_0 = arith.constant 0 : index
    %0 = vector.load %arg1[%c0, %c0_0] : memref<8x32xbf16, #tpu.memory_space<vmem>>, vector<8x32xbf16>
    %c0_1 = arith.constant 0 : index
    %c0_2 = arith.constant 0 : index
    %1 = vector.load %arg2[%c0_1, %c0_2] : memref<32x32xbf16, #tpu.memory_space<vmem>>, vector<32x32xbf16>
    %cst = arith.constant dense<0.000000e+00> : vector<8x32xf32>
    %2 = tpu.matmul %0, %1, %cst {dimension_numbers = #tpu.dot_dimension_numbers<[1], [0], [0], [1], [0, 0, 1, 1], [], []>} : vector<8x32xbf16>, vector<32x32xbf16>, vector<8x32xf32> -> vector<8x32xf32>
    %c0_3 = arith.constant 0 : index
    %c0_4 = arith.constant 0 : index
    %3 = vector.load %arg3[%c0_3, %c0_4] : memref<1x32xf32, #tpu.memory_space<vmem>>, vector<1x32xf32>
    %4 = vector.broadcast %3 : vector<1x32xf32> to vector<8x32xf32>
    %5 = arith.addf %2, %4 : vector<8x32xf32>
    %c0_5 = arith.constant 0 : index
    %c0_6 = arith.constant 0 : index
    %6 = vector.load %arg4[%c0_5, %c0_6] : memref<8x32xf32, #tpu.memory_space<vmem>>, vector<8x32xf32>
    %7 = arith.addf %5, %6 : vector<8x32xf32>
    %cst_7 = arith.constant dense<0.000000e+00> : vector<8xf32>
    %8 = vector.multi_reduction <add>, %7, %cst_7 [1] : vector<8x32xf32> to vector<8xf32>
    %9 = vector.shape_cast %8 : vector<8xf32> to vector<8x1xf32>
    %cst_8 = arith.constant 3.200000e+01 : f32
    %10 = vector.broadcast %cst_8 : f32 to vector<8x1xf32>
    %11 = arith.divf %9, %10 : vector<8x1xf32>
    %12 = vector.broadcast %11 : vector<8x1xf32> to vector<8x32xf32>
    %13 = arith.subf %7, %12 : vector<8x32xf32>
    %14 = arith.mulf %13, %13 : vector<8x32xf32>
    %cst_9 = arith.constant dense<0.000000e+00> : vector<8xf32>
    %15 = vector.multi_reduction <add>, %14, %cst_9 [1] : vector<8x32xf32> to vector<8xf32>
    %16 = vector.shape_cast %15 : vector<8xf32> to vector<8x1xf32>
    %cst_10 = arith.constant 3.200000e+01 : f32
    %17 = vector.broadcast %cst_10 : f32 to vector<8x1xf32>
    %18 = arith.divf %16, %17 : vector<8x1xf32>
    %19 = vector.broadcast %11 : vector<8x1xf32> to vector<8x32xf32>
    %20 = arith.subf %7, %19 : vector<8x32xf32>
    %cst_11 = arith.constant 9.99999974E-6 : f32
    %21 = vector.broadcast %cst_11 : f32 to vector<8x1xf32>
    %22 = arith.addf %18, %21 : vector<8x1xf32>
    %23 = math.rsqrt %22 : vector<8x1xf32>
    %24 = vector.broadcast %23 : vector<8x1xf32> to vector<8x32xf32>
    %25 = arith.mulf %20, %24 : vector<8x32xf32>
    %c0_12 = arith.constant 0 : index
    %c0_13 = arith.constant 0 : index
    %26 = vector.load %arg5[%c0_12, %c0_13] : memref<1x32xf32, #tpu.memory_space<vmem>>, vector<1x32xf32>
    %27 = vector.broadcast %26 : vector<1x32xf32> to vector<8x32xf32>
    %28 = arith.mulf %25, %27 : vector<8x32xf32>
    %c0_14 = arith.constant 0 : index
    %c0_15 = arith.constant 0 : index
    %29 = vector.load %arg6[%c0_14, %c0_15] : memref<1x32xf32, #tpu.memory_space<vmem>>, vector<1x32xf32>
    %30 = vector.broadcast %29 : vector<1x32xf32> to vector<8x32xf32>
    %31 = arith.addf %28, %30 : vector<8x32xf32>
    %c0_16 = arith.constant 0 : index
    %c0_17 = arith.constant 0 : index
    %32 = vector.load %arg7[%c0_16, %c0_17] : memref<8x32xf32, #tpu.memory_space<vmem>>, vector<8x32xf32>
    tpu.vector_store %arg7[%c0_16, %c0_17], %31 {strides = array<i32>} : memref<8x32xf32, #tpu.memory_space<vmem>>, vector<8x32xf32>,
    return
  }
  func.func @transform_0(%arg0: i32) -> (i32, i32) {
    %c0_i32 = arith.constant 0 : i32
    %c0_i32_0 = arith.constant 0 : i32
    return %arg0, %c0_i32 : i32, i32
  }
  func.func @transform_1(%arg0: i32) -> (i32, i32) {
    %c0_i32 = arith.constant 0 : i32
    %c0_i32_0 = arith.constant 0 : i32
    %c0_i32_1 = arith.constant 0 : i32
    return %c0_i32, %c0_i32_0 : i32, i32
  }
  func.func @transform_2(%arg0: i32) -> (i32, i32) {
    %c0_i32 = arith.constant 0 : i32
    %c0_i32_0 = arith.constant 0 : i32
    %c0_i32_1 = arith.constant 0 : i32
    return %c0_i32, %c0_i32_0 : i32, i32
  }
  func.func @transform_3(%arg0: i32) -> (i32, i32) {
    %c0_i32 = arith.constant 0 : i32
    %c0_i32_0 = arith.constant 0 : i32
    return %arg0, %c0_i32 : i32, i32
  }
  func.func @transform_4(%arg0: i32) -> (i32, i32) {
    %c0_i32 = arith.constant 0 : i32
    %c0_i32_0 = arith.constant 0 : i32
    %c0_i32_1 = arith.constant 0 : i32
    return %c0_i32, %c0_i32_0 : i32, i32
  }
  func.func @transform_5(%arg0: i32) -> (i32, i32) {
    %c0_i32 = arith.constant 0 : i32
    %c0_i32_0 = arith.constant 0 : i32
    %c0_i32_1 = arith.constant 0 : i32
    return %c0_i32, %c0_i32_0 : i32, i32
  }
  func.func @transform_6(%arg0: i32) -> (i32, i32) {
    %c0_i32 = arith.constant 0 : i32
    %c0_i32_0 = arith.constant 0 : i32
    return %arg0, %c0_i32 : i32, i32
  }
}

module attributes {stable_mosaic.version = 11 : i64} {
  func.func @_grouped_linear_kernel(%arg0: i32, %arg1: i32, %arg2: i32, %arg3: memref<8x32xf32, #tpu.memory_space<vmem>>, %arg4: memref<1x32x32xbf16, #tpu.memory_space<vmem>>, %arg5: memref<1x1x32xf32, #tpu.memory_space<vmem>>, %arg6: memref<1x8x32xbf16, #tpu.memory_space<vmem>>, %arg7: memref<8x32xf32, #tpu.memory_space<vmem>>) attributes {dimension_semantics = [#tpu.dimension_semantics<parallel>, #tpu.dimension_semantics<parallel>, #tpu.dimension_semantics<arbitrary>], iteration_bounds = array<i64: 2, 2, 1>, scalar_prefetch = 0 : i64, scratch_operands = 1 : i64, tpu.core_type = #tpu.core_type<tc>, window_params = [{transform_indices = @transform_0, window_bounds = array<i64: 8, 32>}, {transform_indices = @transform_1, window_bounds = array<i64: 1, 32, 32>}, {transform_indices = @transform_2, window_bounds = array<i64: 1, 1, 32>}, {transform_indices = @transform_3, window_bounds = array<i64: 1, 8, 32>}]} {
    %c0_i32 = arith.constant 0 : i32
    %0 = arith.cmpi eq, %arg2, %c0_i32 : i32
    %1 = arith.extui %0 : i1 to i32
    %c0_i32_0 = arith.constant 0 : i32
    %2 = arith.cmpi ne, %1, %c0_i32_0 : i32
    scf.if %2 {
      %cst_11 = arith.constant 0.000000e+00 : f32
      %14 = vector.broadcast %cst_11 : f32 to vector<8x32xf32>
      %c0_12 = arith.constant 0 : index
      %c0_13 = arith.constant 0 : index
      %15 = vector.load %arg7[%c0_12, %c0_13] : memref<8x32xf32, #tpu.memory_space<vmem>>, vector<8x32xf32>
      tpu.vector_store %arg7[%c0_12, %c0_13], %14 {strides = array<i32>} : memref<8x32xf32, #tpu.memory_space<vmem>>, vector<8x32xf32>,
    } else {
    }
    %c0 = arith.constant 0 : index
    %c0_1 = arith.constant 0 : index
    %3 = vector.load %arg7[%c0, %c0_1] : memref<8x32xf32, #tpu.memory_space<vmem>>, vector<8x32xf32>
    %c0_2 = arith.constant 0 : index
    %c0_3 = arith.constant 0 : index
    %4 = vector.load %arg3[%c0_2, %c0_3] : memref<8x32xf32, #tpu.memory_space<vmem>>, vector<8x32xf32>
    %5 = arith.truncf %4 : vector<8x32xf32> to vector<8x32xbf16>
    %c0_4 = arith.constant 0 : index
    %c0_5 = arith.constant 0 : index
    %c0_6 = arith.constant 0 : index
    %6 = vector.load %arg4[%c0_4, %c0_5, %c0_6] : memref<1x32x32xbf16, #tpu.memory_space<vmem>>, vector<1x32x32xbf16>
    %7 = vector.shape_cast %6 : vector<1x32x32xbf16> to vector<32x32xbf16>
    %cst = arith.constant dense<0.000000e+00> : vector<8x32xf32>
    %8 = tpu.matmul %5, %7, %cst {dimension_numbers = #tpu.dot_dimension_numbers<[1], [0], [0], [1], [0, 0, 1, 1], [], []>} : vector<8x32xbf16>, vector<32x32xbf16>, vector<8x32xf32> -> vector<8x32xf32>
    %9 = arith.addf %3, %8 : vector<8x32xf32>
    %c0_7 = arith.constant 0 : index
    %c0_8 = arith.constant 0 : index
    %10 = vector.load %arg7[%c0_7, %c0_8] : memref<8x32xf32, #tpu.memory_space<vmem>>, vector<8x32xf32>
    tpu.vector_store %arg7[%c0_7, %c0_8], %9 {strides = array<i32>} : memref<8x32xf32, #tpu.memory_space<vmem>>, vector<8x32xf32>,
    %c0_i32_9 = arith.constant 0 : i32
    %11 = arith.cmpi eq, %arg2, %c0_i32_9 : i32
    %12 = arith.extui %11 : i1 to i32
    %c0_i32_10 = arith.constant 0 : i32
    %13 = arith.cmpi ne, %12, %c0_i32_10 : i32
    scf.if %13 {
      %c0_11 = arith.constant 0 : index
      %c0_12 = arith.constant 0 : index
      %14 = vector.load %arg7[%c0_11, %c0_12] : memref<8x32xf32, #tpu.memory_space<vmem>>, vector<8x32xf32>
      %c0_13 = arith.constant 0 : index
      %c0_14 = arith.constant 0 : index
      %c0_15 = arith.constant 0 : index
      %15 = vector.load %arg5[%c0_13, %c0_14, %c0_15] : memref<1x1x32xf32, #tpu.memory_space<vmem>>, vector<1x1x32xf32>
      %16 = vector.shape_cast %15 : vector<1x1x32xf32> to vector<1x32xf32>
      %17 = vector.broadcast %16 : vector<1x32xf32> to vector<8x32xf32>
      %18 = arith.addf %14, %17 : vector<8x32xf32>
      %19 = arith.truncf %18 : vector<8x32xf32> to vector<8x32xbf16>
      %c0_16 = arith.constant 0 : index
      %c0_17 = arith.constant 0 : index
      %c0_18 = arith.constant 0 : index
      %20 = vector.load %arg6[%c0_16, %c0_17, %c0_18] : memref<1x8x32xbf16, #tpu.memory_space<vmem>>, vector<1x8x32xbf16>
      %21 = vector.shape_cast %20 : vector<1x8x32xbf16> to vector<8x32xbf16>
      %22 = vector.shape_cast %19 : vector<8x32xbf16> to vector<1x8x32xbf16>
      tpu.vector_store %arg6[%c0_16, %c0_17, %c0_18], %22 {strides = array<i32>} : memref<1x8x32xbf16, #tpu.memory_space<vmem>>, vector<1x8x32xbf16>,
    } else {
    }
    return
  }
  func.func @transform_0(%arg0: i32, %arg1: i32, %arg2: i32) -> (i32, i32) {
    %c0_i32 = arith.constant 0 : i32
    return %arg0, %arg2 : i32, i32
  }
  func.func @transform_1(%arg0: i32, %arg1: i32, %arg2: i32) -> (i32, i32, i32) {
    %c0_i32 = arith.constant 0 : i32
    %c0_i32_0 = arith.constant 0 : i32
    return %arg1, %arg2, %c0_i32 : i32, i32, i32
  }
  func.func @transform_2(%arg0: i32, %arg1: i32, %arg2: i32) -> (i32, i32, i32) {
    %c0_i32 = arith.constant 0 : i32
    %c0_i32_0 = arith.constant 0 : i32
    %c0_i32_1 = arith.constant 0 : i32
    return %arg1, %c0_i32, %c0_i32_0 : i32, i32, i32
  }
  func.func @transform_3(%arg0: i32, %arg1: i32, %arg2: i32) -> (i32, i32, i32) {
    %c0_i32 = arith.constant 0 : i32
    %c0_i32_0 = arith.constant 0 : i32
    return %arg1, %arg0, %c0_i32 : i32, i32, i32
  }
}

module attributes {stable_mosaic.version = 11 : i64} {
  func.func @_attn_kernel(%arg0: i32, %arg1: i32, %arg2: memref<1x1x8x32xbf16, #tpu.memory_space<vmem>>, %arg3: memref<1x1x8x32xbf16, #tpu.memory_space<vmem>>, %arg4: memref<1x1x8x32xbf16, #tpu.memory_space<vmem>>, %arg5: memref<1x8x32xbf16, #tpu.memory_space<vmem>>) attributes {dimension_semantics = [#tpu.dimension_semantics<parallel>, #tpu.dimension_semantics<parallel>], iteration_bounds = array<i64: 2, 1>, scalar_prefetch = 0 : i64, scratch_operands = 0 : i64, tpu.core_type = #tpu.core_type<tc>, window_params = [{transform_indices = @transform_0, window_bounds = array<i64: 1, 1, 8, 32>}, {transform_indices = @transform_1, window_bounds = array<i64: 1, 1, 8, 32>}, {transform_indices = @transform_2, window_bounds = array<i64: 1, 1, 8, 32>}, {transform_indices = @transform_3, window_bounds = array<i64: 1, 8, 32>}]} {
    %c0 = arith.constant 0 : index
    %c0_0 = arith.constant 0 : index
    %c0_1 = arith.constant 0 : index
    %c0_2 = arith.constant 0 : index
    %0 = vector.load %arg2[%c0, %c0_0, %c0_1, %c0_2] : memref<1x1x8x32xbf16, #tpu.memory_space<vmem>>, vector<1x1x8x32xbf16>
    %1 = vector.shape_cast %0 : vector<1x1x8x32xbf16> to vector<8x32xbf16>
    %c0_3 = arith.constant 0 : index
    %c0_4 = arith.constant 0 : index
    %c0_5 = arith.constant 0 : index
    %c0_6 = arith.constant 0 : index
    %2 = vector.load %arg3[%c0_3, %c0_4, %c0_5, %c0_6] : memref<1x1x8x32xbf16, #tpu.memory_space<vmem>>, vector<1x1x8x32xbf16>
    %3 = vector.shape_cast %2 : vector<1x1x8x32xbf16> to vector<8x32xbf16>
    %c0_7 = arith.constant 0 : index
    %c0_8 = arith.constant 0 : index
    %c0_9 = arith.constant 0 : index
    %c0_10 = arith.constant 0 : index
    %4 = vector.load %arg4[%c0_7, %c0_8, %c0_9, %c0_10] : memref<1x1x8x32xbf16, #tpu.memory_space<vmem>>, vector<1x1x8x32xbf16>
    %5 = vector.shape_cast %4 : vector<1x1x8x32xbf16> to vector<8x32xbf16>
    %6 = vector.extract_strided_slice %1 {offsets = [0, 0], sizes = [8, 8], strides = [1, 1]} : vector<8x32xbf16> to vector<8x8xbf16>
    %7 = vector.extract_strided_slice %3 {offsets = [0, 0], sizes = [8, 8], strides = [1, 1]} : vector<8x32xbf16> to vector<8x8xbf16>
    %cst = arith.constant dense<0.000000e+00> : vector<8x8xf32>
    %8 = tpu.matmul %6, %7, %cst {dimension_numbers = #tpu.dot_dimension_numbers<[1], [1], [0], [0], [0, 0, 1, 0], [], []>} : vector<8x8xbf16>, vector<8x8xbf16>, vector<8x8xf32> -> vector<8x8xf32>
    %cst_11 = arith.constant dense<0xFF800000> : vector<8xf32>
    %9 = vector.multi_reduction <maximumf>, %8, %cst_11 [1] : vector<8x8xf32> to vector<8xf32>
    %10 = vector.shape_cast %9 : vector<8xf32> to vector<8x1xf32>
    %11 = vector.broadcast %10 : vector<8x1xf32> to vector<8x8xf32>
    %12 = arith.subf %8, %11 : vector<8x8xf32>
    %13 = math.exp %12 : vector<8x8xf32>
    %cst_12 = arith.constant dense<0.000000e+00> : vector<8xf32>
    %14 = vector.multi_reduction <add>, %13, %cst_12 [1] : vector<8x8xf32> to vector<8xf32>
    %15 = vector.shape_cast %14 : vector<8xf32> to vector<8x1xf32>
    %16 = arith.truncf %13 : vector<8x8xf32> to vector<8x8xbf16>
    %17 = vector.extract_strided_slice %5 {offsets = [0, 0], sizes = [8, 8], strides = [1, 1]} : vector<8x32xbf16> to vector<8x8xbf16>
    %cst_13 = arith.constant dense<0.000000e+00> : vector<8x8xf32>
    %18 = tpu.matmul %16, %17, %cst_13 {dimension_numbers = #tpu.dot_dimension_numbers<[1], [0], [0], [1], [0, 0, 1, 1], [], []>} : vector<8x8xbf16>, vector<8x8xbf16>, vector<8x8xf32> -> vector<8x8xf32>
    %19 = tpu.reciprocal %15 {approx = true} : vector<8x1xf32> -> vector<8x1xf32>
    %20 = vector.broadcast %19 : vector<8x1xf32> to vector<8x8xf32>
    %21 = arith.mulf %18, %20 : vector<8x8xf32>
    %22 = vector.extract_strided_slice %1 {offsets = [0, 8], sizes = [8, 8], strides = [1, 1]} : vector<8x32xbf16> to vector<8x8xbf16>
    %23 = vector.extract_strided_slice %3 {offsets = [0, 8], sizes = [8, 8], strides = [1, 1]} : vector<8x32xbf16> to vector<8x8xbf16>
    %cst_14 = arith.constant dense<0.000000e+00> : vector<8x8xf32>
    %24 = tpu.matmul %22, %23, %cst_14 {dimension_numbers = #tpu.dot_dimension_numbers<[1], [1], [0], [0], [0, 0, 1, 0], [], []>} : vector<8x8xbf16>, vector<8x8xbf16>, vector<8x8xf32> -> vector<8x8xf32>
    %cst_15 = arith.constant dense<0xFF800000> : vector<8xf32>
    %25 = vector.multi_reduction <maximumf>, %24, %cst_15 [1] : vector<8x8xf32> to vector<8xf32>
    %26 = vector.shape_cast %25 : vector<8xf32> to vector<8x1xf32>
    %27 = vector.broadcast %26 : vector<8x1xf32> to vector<8x8xf32>
    %28 = arith.subf %24, %27 : vector<8x8xf32>
    %29 = math.exp %28 : vector<8x8xf32>
    %cst_16 = arith.constant dense<0.000000e+00> : vector<8xf32>
    %30 = vector.multi_reduction <add>, %29, %cst_16 [1] : vector<8x8xf32> to vector<8xf32>
    %31 = vector.shape_cast %30 : vector<8xf32> to vector<8x1xf32>
    %32 = arith.truncf %29 : vector<8x8xf32> to vector<8x8xbf16>
    %33 = vector.extract_strided_slice %5 {offsets = [0, 8], sizes = [8, 8], strides = [1, 1]} : vector<8x32xbf16> to vector<8x8xbf16>
    %cst_17 = arith.constant dense<0.000000e+00> : vector<8x8xf32>
    %34 = tpu.matmul %32, %33, %cst_17 {dimension_numbers = #tpu.dot_dimension_numbers<[1], [0], [0], [1], [0, 0, 1, 1], [], []>} : vector<8x8xbf16>, vector<8x8xbf16>, vector<8x8xf32> -> vector<8x8xf32>
    %35 = tpu.reciprocal %31 {approx = true} : vector<8x1xf32> -> vector<8x1xf32>
    %36 = vector.broadcast %35 : vector<8x1xf32> to vector<8x8xf32>
    %37 = arith.mulf %34, %36 : vector<8x8xf32>
    %38 = vector.extract_strided_slice %1 {offsets = [0, 16], sizes = [8, 8], strides = [1, 1]} : vector<8x32xbf16> to vector<8x8xbf16>
    %39 = vector.extract_strided_slice %3 {offsets = [0, 16], sizes = [8, 8], strides = [1, 1]} : vector<8x32xbf16> to vector<8x8xbf16>
    %cst_18 = arith.constant dense<0.000000e+00> : vector<8x8xf32>
    %40 = tpu.matmul %38, %39, %cst_18 {dimension_numbers = #tpu.dot_dimension_numbers<[1], [1], [0], [0], [0, 0, 1, 0], [], []>} : vector<8x8xbf16>, vector<8x8xbf16>, vector<8x8xf32> -> vector<8x8xf32>
    %cst_19 = arith.constant dense<0xFF800000> : vector<8xf32>
    %41 = vector.multi_reduction <maximumf>, %40, %cst_19 [1] : vector<8x8xf32> to vector<8xf32>
    %42 = vector.shape_cast %41 : vector<8xf32> to vector<8x1xf32>
    %43 = vector.broadcast %42 : vector<8x1xf32> to vector<8x8xf32>
    %44 = arith.subf %40, %43 : vector<8x8xf32>
    %45 = math.exp %44 : vector<8x8xf32>
    %cst_20 = arith.constant dense<0.000000e+00> : vector<8xf32>
    %46 = vector.multi_reduction <add>, %45, %cst_20 [1] : vector<8x8xf32> to vector<8xf32>
    %47 = vector.shape_cast %46 : vector<8xf32> to vector<8x1xf32>
    %48 = arith.truncf %45 : vector<8x8xf32> to vector<8x8xbf16>
    %49 = vector.extract_strided_slice %5 {offsets = [0, 16], sizes = [8, 8], strides = [1, 1]} : vector<8x32xbf16> to vector<8x8xbf16>
    %cst_21 = arith.constant dense<0.000000e+00> : vector<8x8xf32>
    %50 = tpu.matmul %48, %49, %cst_21 {dimension_numbers = #tpu.dot_dimension_numbers<[1], [0], [0], [1], [0, 0, 1, 1], [], []>} : vector<8x8xbf16>, vector<8x8xbf16>, vector<8x8xf32> -> vector<8x8xf32>
    %51 = tpu.reciprocal %47 {approx = true} : vector<8x1xf32> -> vector<8x1xf32>
    %52 = vector.broadcast %51 : vector<8x1xf32> to vector<8x8xf32>
    %53 = arith.mulf %50, %52 : vector<8x8xf32>
    %54 = vector.extract_strided_slice %1 {offsets = [0, 24], sizes = [8, 8], strides = [1, 1]} : vector<8x32xbf16> to vector<8x8xbf16>
    %55 = vector.extract_strided_slice %3 {offsets = [0, 24], sizes = [8, 8], strides = [1, 1]} : vector<8x32xbf16> to vector<8x8xbf16>
    %cst_22 = arith.constant dense<0.000000e+00> : vector<8x8xf32>
    %56 = tpu.matmul %54, %55, %cst_22 {dimension_numbers = #tpu.dot_dimension_numbers<[1], [1], [0], [0], [0, 0, 1, 0], [], []>} : vector<8x8xbf16>, vector<8x8xbf16>, vector<8x8xf32> -> vector<8x8xf32>
    %cst_23 = arith.constant dense<0xFF800000> : vector<8xf32>
    %57 = vector.multi_reduction <maximumf>, %56, %cst_23 [1] : vector<8x8xf32> to vector<8xf32>
    %58 = vector.shape_cast %57 : vector<8xf32> to vector<8x1xf32>
    %59 = vector.broadcast %58 : vector<8x1xf32> to vector<8x8xf32>
    %60 = arith.subf %56, %59 : vector<8x8xf32>
    %61 = math.exp %60 : vector<8x8xf32>
    %cst_24 = arith.constant dense<0.000000e+00> : vector<8xf32>
    %62 = vector.multi_reduction <add>, %61, %cst_24 [1] : vector<8x8xf32> to vector<8xf32>
    %63 = vector.shape_cast %62 : vector<8xf32> to vector<8x1xf32>
    %64 = arith.truncf %61 : vector<8x8xf32> to vector<8x8xbf16>
    %65 = vector.extract_strided_slice %5 {offsets = [0, 24], sizes = [8, 8], strides = [1, 1]} : vector<8x32xbf16> to vector<8x8xbf16>
    %cst_25 = arith.constant dense<0.000000e+00> : vector<8x8xf32>
    %66 = tpu.matmul %64, %65, %cst_25 {dimension_numbers = #tpu.dot_dimension_numbers<[1], [0], [0], [1], [0, 0, 1, 1], [], []>} : vector<8x8xbf16>, vector<8x8xbf16>, vector<8x8xf32> -> vector<8x8xf32>
    %67 = tpu.reciprocal %63 {approx = true} : vector<8x1xf32> -> vector<8x1xf32>
    %68 = vector.broadcast %67 : vector<8x1xf32> to vector<8x8xf32>
    %69 = arith.mulf %66, %68 : vector<8x8xf32>
    %70 = tpu.concatenate %21, %37, %53, %69 in 1 : vector<8x8xf32>, vector<8x8xf32>, vector<8x8xf32>, vector<8x8xf32> -> vector<8x32xf32>
    %71 = arith.truncf %70 : vector<8x32xf32> to vector<8x32xbf16>
    %c0_26 = arith.constant 0 : index
    %c0_27 = arith.constant 0 : index
    %c0_28 = arith.constant 0 : index
    %72 = vector.load %arg5[%c0_26, %c0_27, %c0_28] : memref<1x8x32xbf16, #tpu.memory_space<vmem>>, vector<1x8x32xbf16>
    %73 = vector.shape_cast %72 : vector<1x8x32xbf16> to vector<8x32xbf16>
    %74 = vector.shape_cast %71 : vector<8x32xbf16> to vector<1x8x32xbf16>
    tpu.vector_store %arg5[%c0_26, %c0_27, %c0_28], %74 {strides = array<i32>} : memref<1x8x32xbf16, #tpu.memory_space<vmem>>, vector<1x8x32xbf16>,
    return
  }
  func.func @transform_0(%arg0: i32, %arg1: i32) -> (i32, i32, i32, i32) {
    %c0_i32 = arith.constant 0 : i32
    %c0_i32_0 = arith.constant 0 : i32
    %c0_i32_1 = arith.constant 0 : i32
    return %c0_i32, %arg0, %arg1, %c0_i32_0 : i32, i32, i32, i32
  }
  func.func @transform_1(%arg0: i32, %arg1: i32) -> (i32, i32, i32, i32) {
    %c0_i32 = arith.constant 0 : i32
    %c0_i32_0 = arith.constant 0 : i32
    %c0_i32_1 = arith.constant 0 : i32
    %c0_i32_2 = arith.constant 0 : i32
    return %c0_i32, %arg0, %c0_i32_0, %c0_i32_1 : i32, i32, i32, i32
  }
  func.func @transform_2(%arg0: i32, %arg1: i32) -> (i32, i32, i32, i32) {
    %c1_i32 = arith.constant 1 : i32
    %c0_i32 = arith.constant 0 : i32
    %c0_i32_0 = arith.constant 0 : i32
    %c0_i32_1 = arith.constant 0 : i32
    return %c1_i32, %arg0, %c0_i32, %c0_i32_0 : i32, i32, i32, i32
  }
  func.func @transform_3(%arg0: i32, %arg1: i32) -> (i32, i32, i32) {
    %c0_i32 = arith.constant 0 : i32
    %c0_i32_0 = arith.constant 0 : i32
    return %arg0, %arg1, %c0_i32 : i32, i32, i32
  }
}

module attributes {stable_mosaic.version = 11 : i64} {
  func.func @_ffn_add_ln_kernel(%arg0: i32, %arg1: i32, %arg2: memref<8x32xf32, #tpu.memory_space<vmem>>, %arg3: memref<32x128xbf16, #tpu.memory_space<vmem>>, %arg4: memref<1x128xf32, #tpu.memory_space<vmem>>, %arg5: memref<128x32xbf16, #tpu.memory_space<vmem>>, %arg6: memref<1x32xf32, #tpu.memory_space<vmem>>, %arg7: memref<1x32xf32, #tpu.memory_space<vmem>>, %arg8: memref<1x32xf32, #tpu.memory_space<vmem>>, %arg9: memref<8x32xf32, #tpu.memory_space<vmem>>, %arg10: memref<8x32xf32, #tpu.memory_space<vmem>>) attributes {dimension_semantics = [#tpu.dimension_semantics<parallel>, #tpu.dimension_semantics<arbitrary>], iteration_bounds = array<i64: 2, 1>, scalar_prefetch = 0 : i64, scratch_operands = 1 : i64, tpu.core_type = #tpu.core_type<tc>, window_params = [{transform_indices = @transform_0, window_bounds = array<i64: 8, 32>}, {transform_indices = @transform_1, window_bounds = array<i64: 32, 128>}, {transform_indices = @transform_2, window_bounds = array<i64: 1, 128>}, {transform_indices = @transform_3, window_bounds = array<i64: 128, 32>}, {pipeline_mode = #tpu.pipeline_mode<synchronous>, transform_indices = @transform_4, window_bounds = array<i64: 1, 32>}, {pipeline_mode = #tpu.pipeline_mode<synchronous>, transform_indices = @transform_5, window_bounds = array<i64: 1, 32>}, {pipeline_mode = #tpu.pipeline_mode<synchronous>, transform_indices = @transform_6, window_bounds = array<i64: 1, 32>}, {transform_indices = @transform_7, window_bounds = array<i64: 8, 32>}]} {
    %c0_i32 = arith.constant 0 : i32
    %0 = arith.cmpi eq, %arg1, %c0_i32 : i32
    %1 = arith.extui %0 : i1 to i32
    %c0_i32_0 = arith.constant 0 : i32
    %2 = arith.cmpi ne, %1, %c0_i32_0 : i32
    scf.if %2 {
      %cst_16 = arith.constant 0.000000e+00 : f32
      %21 = vector.broadcast %cst_16 : f32 to vector<8x32xf32>
      %c0_17 = arith.constant 0 : index
      %c0_18 = arith.constant 0 : index
      %22 = vector.load %arg10[%c0_17, %c0_18] : memref<8x32xf32, #tpu.memory_space<vmem>>, vector<8x32xf32>
      tpu.vector_store %arg10[%c0_17, %c0_18], %21 {strides = array<i32>} : memref<8x32xf32, #tpu.memory_space<vmem>>, vector<8x32xf32>,
    } else {
    }
    %c0 = arith.constant 0 : index
    %c0_1 = arith.constant 0 : index
    %3 = vector.load %arg2[%c0, %c0_1] : memref<8x32xf32, #tpu.memory_space<vmem>>, vector<8x32xf32>
    %4 = arith.truncf %3 : vector<8x32xf32> to vector<8x32xbf16>
    %c0_2 = arith.constant 0 : index
    %c0_3 = arith.constant 0 : index
    %5 = vector.load %arg3[%c0_2, %c0_3] : memref<32x128xbf16, #tpu.memory_space<vmem>>, vector<32x128xbf16>
    %cst = arith.constant dense<0.000000e+00> : vector<8x128xf32>
    %6 = tpu.matmul %4, %5, %cst {dimension_numbers = #tpu.dot_dimension_numbers<[1], [0], [0], [1], [0, 0, 1, 1], [], []>} : vector<8x32xbf16>, vector<32x128xbf16>, vector<8x128xf32> -> vector<8x128xf32>
    %c0_4 = arith.constant 0 : index
    %c0_5 = arith.constant 0 : index
    %7 = vector.load %arg4[%c0_4, %c0_5] : memref<1x128xf32, #tpu.memory_space<vmem>>, vector<1x128xf32>
    %8 = vector.broadcast %7 : vector<1x128xf32> to vector<8x128xf32>
    %9 = arith.addf %6, %8 : vector<8x128xf32>
    %cst_6 = arith.constant 0.000000e+00 : f32
    %10 = vector.broadcast %cst_6 : f32 to vector<8x128xf32>
    %11 = arith.maximumf %9, %10 : vector<8x128xf32>
    %c0_7 = arith.constant 0 : index
    %c0_8 = arith.constant 0 : index
    %12 = vector.load %arg10[%c0_7, %c0_8] : memref<8x32xf32, #tpu.memory_space<vmem>>, vector<8x32xf32>
    %13 = arith.truncf %11 : vector<8x128xf32> to vector<8x128xbf16>
    %c0_9 = arith.constant 0 : index
    %c0_10 = arith.constant 0 : index
    %14 = vector.load %arg5[%c0_9, %c0_10] : memref<128x32xbf16, #tpu.memory_space<vmem>>, vector<128x32xbf16>
    %cst_11 = arith.constant dense<0.000000e+00> : vector<8x32xf32>
    %15 = tpu.matmul %13, %14, %cst_11 {dimension_numbers = #tpu.dot_dimension_numbers<[1], [0], [0], [1], [0, 0, 1, 1], [], []>} : vector<8x128xbf16>, vector<128x32xbf16>, vector<8x32xf32> -> vector<8x32xf32>
    %16 = arith.addf %12, %15 : vector<8x32xf32>
    %c0_12 = arith.constant 0 : index
    %c0_13 = arith.constant 0 : index
    %17 = vector.load %arg10[%c0_12, %c0_13] : memref<8x32xf32, #tpu.memory_space<vmem>>, vector<8x32xf32>
    tpu.vector_store %arg10[%c0_12, %c0_13], %16 {strides = array<i32>} : memref<8x32xf32, #tpu.memory_space<vmem>>, vector<8x32xf32>,
    %c0_i32_14 = arith.constant 0 : i32
    %18 = arith.cmpi eq, %arg1, %c0_i32_14 : i32
    %19 = arith.extui %18 : i1 to i32
    %c0_i32_15 = arith.constant 0 : i32
    %20 = arith.cmpi ne, %19, %c0_i32_15 : i32
    scf.if %20 {
      %c0_16 = arith.constant 0 : index
      %c0_17 = arith.constant 0 : index
      %21 = vector.load %arg2[%c0_16, %c0_17] : memref<8x32xf32, #tpu.memory_space<vmem>>, vector<8x32xf32>
      %c0_18 = arith.constant 0 : index
      %c0_19 = arith.constant 0 : index
      %22 = vector.load %arg10[%c0_18, %c0_19] : memref<8x32xf32, #tpu.memory_space<vmem>>, vector<8x32xf32>
      %23 = arith.addf %21, %22 : vector<8x32xf32>
      %c0_20 = arith.constant 0 : index
      %c0_21 = arith.constant 0 : index
      %24 = vector.load %arg6[%c0_20, %c0_21] : memref<1x32xf32, #tpu.memory_space<vmem>>, vector<1x32xf32>
      %25 = vector.broadcast %24 : vector<1x32xf32> to vector<8x32xf32>
      %26 = arith.addf %23, %25 : vector<8x32xf32>
      %cst_22 = arith.constant dense<0.000000e+00> : vector<8xf32>
      %27 = vector.multi_reduction <add>, %26, %cst_22 [1] : vector<8x32xf32> to vector<8xf32>
      %28 = vector.shape_cast %27 : vector<8xf32> to vector<8x1xf32>
      %cst_23 = arith.constant 3.200000e+01 : f32
      %29 = vector.broadcast %cst_23 : f32 to vector<8x1xf32>
      %30 = arith.divf %28, %29 : vector<8x1xf32>
      %31 = vector.broadcast %30 : vector<8x1xf32> to vector<8x32xf32>
      %32 = arith.subf %26, %31 : vector<8x32xf32>
      %33 = arith.mulf %32, %32 : vector<8x32xf32>
      %cst_24 = arith.constant dense<0.000000e+00> : vector<8xf32>
      %34 = vector.multi_reduction <add>, %33, %cst_24 [1] : vector<8x32xf32> to vector<8xf32>
      %35 = vector.shape_cast %34 : vector<8xf32> to vector<8x1xf32>
      %cst_25 = arith.constant 3.200000e+01 : f32
      %36 = vector.broadcast %cst_25 : f32 to vector<8x1xf32>
      %37 = arith.divf %35, %36 : vector<8x1xf32>
      %38 = vector.broadcast %30 : vector<8x1xf32> to vector<8x32xf32>
      %39 = arith.subf %26, %38 : vector<8x32xf32>
      %cst_26 = arith.constant 9.99999974E-6 : f32
      %40 = vector.broadcast %cst_26 : f32 to vector<8x1xf32>
      %41 = arith.addf %37, %40 : vector<8x1xf32>
      %42 = math.rsqrt %41 : vector<8x1xf32>
      %43 = vector.broadcast %42 : vector<8x1xf32> to vector<8x32xf32>
      %44 = arith.mulf %39, %43 : vector<8x32xf32>
      %c0_27 = arith.constant 0 : index
      %c0_28 = arith.constant 0 : index
      %45 = vector.load %arg7[%c0_27, %c0_28] : memref<1x32xf32, #tpu.memory_space<vmem>>, vector<1x32xf32>
      %46 = vector.broadcast %45 : vector<1x32xf32> to vector<8x32xf32>
      %47 = arith.mulf %44, %46 : vector<8x32xf32>
      %c0_29 = arith.constant 0 : index
      %c0_30 = arith.constant 0 : index
      %48 = vector.load %arg8[%c0_29, %c0_30] : memref<1x32xf32, #tpu.memory_space<vmem>>, vector<1x32xf32>
      %49 = vector.broadcast %48 : vector<1x32xf32> to vector<8x32xf32>
      %50 = arith.addf %47, %49 : vector<8x32xf32>
      %c0_31 = arith.constant 0 : index
      %c0_32 = arith.constant 0 : index
      %51 = vector.load %arg9[%c0_31, %c0_32] : memref<8x32xf32, #tpu.memory_space<vmem>>, vector<8x32xf32>
      tpu.vector_store %arg9[%c0_31, %c0_32], %50 {strides = array<i32>} : memref<8x32xf32, #tpu.memory_space<vmem>>, vector<8x32xf32>,
    } else {
    }
    return
  }
  func.func @transform_0(%arg0: i32, %arg1: i32) -> (i32, i32) {
    %c0_i32 = arith.constant 0 : i32
    %c0_i32_0 = arith.constant 0 : i32
    return %arg0, %c0_i32 : i32, i32
  }
  func.func @transform_1(%arg0: i32, %arg1: i32) -> (i32, i32) {
    %c0_i32 = arith.constant 0 : i32
    %c0_i32_0 = arith.constant 0 : i32
    return %c0_i32, %arg1 : i32, i32
  }
  func.func @transform_2(%arg0: i32, %arg1: i32) -> (i32, i32) {
    %c0_i32 = arith.constant 0 : i32
    %c0_i32_0 = arith.constant 0 : i32
    return %c0_i32, %arg1 : i32, i32
  }
  func.func @transform_3(%arg0: i32, %arg1: i32) -> (i32, i32) {
    %c0_i32 = arith.constant 0 : i32
    %c0_i32_0 = arith.constant 0 : i32
    return %arg1, %c0_i32 : i32, i32
  }
  func.func @transform_4(%arg0: i32, %arg1: i32) -> (i32, i32) {
    %c0_i32 = arith.constant 0 : i32
    %c0_i32_0 = arith.constant 0 : i32
    %c0_i32_1 = arith.constant 0 : i32
    return %c0_i32, %c0_i32_0 : i32, i32
  }
  func.func @transform_5(%arg0: i32, %arg1: i32) -> (i32, i32) {
    %c0_i32 = arith.constant 0 : i32
    %c0_i32_0 = arith.constant 0 : i32
    %c0_i32_1 = arith.constant 0 : i32
    return %c0_i32, %c0_i32_0 : i32, i32
  }
  func.func @transform_6(%arg0: i32, %arg1: i32) -> (i32, i32) {
    %c0_i32 = arith.constant 0 : i32
    %c0_i32_0 = arith.constant 0 : i32
    %c0_i32_1 = arith.constant 0 : i32
    return %c0_i32, %c0_i32_0 : i32, i32
  }
  func.func @transform_7(%arg0: i32, %arg1: i32) -> (i32, i32) {
    %c0_i32 = arith.constant 0 : i32
    %c0_i32_0 = arith.constant 0 : i32
    return %arg0, %c0_i32 : i32, i32
  }
}

</mosaic_0001>

<bundles_post_ra>
// kernel: map_encoder_forward.9
= control target key start
LH: loop header
LB: loop body
LE: loop exit
PB: predicated region body
PF: predicated region fallthrough
CT: control target
= control target key end

     0   :  { %s546_s12 = smov 0   ;;  %s548_s13 = smov 0   ;;  %s588_s0 = inlined_call_operand.vmem [shape: f32[16,16], index: 0, kind: input, shape index: {}]   ;;  %s589_s1 = inlined_call_operand.vmem [shape: bf16[1,16,32], index: 1, kind: input, shape index: {}]   ;;  %s590_s2 = inlined_call_operand.vmem [shape: f32[1,1,32], index: 2, kind: input, shape index: {}]   ;;  %s591_s3 = inlined_call_operand.vmem [shape: f32[1,16,32], index: 3, kind: output, shape index: {}]  }
   0x1   :  { %s550_s14 = smov 0  }
   0x2 LB: > { %s32_s15 = sadd.s32 1, %s518_s13  ;;  %p457_p0 = scmp.ge.s32.totalorder %s522_s14, 1  ;;  %s522_s14 = sphi %s550_s14, %s13_s14   ;;  %s518_s13 = sphi %s548_s13, %s593_s13   ;;  %s514_s12 = sphi %s546_s12, %s592_s12  }
   0x3   : > { %p34_p1 = scmp.ge.s32.totalorder %s32_s15, 2  ;;  %p187_p2 = scmp.lt.s32.totalorder %s522_s14, 3 }
   0x5   : > { %s595_s15 = smov (%p34_p1, %s32_s15), 0  ;;  %p188_p3 = pnand %p457_p0, %p187_p2 }
   0x6   : > { %vm261_vm0 = vcmask (!%p188_p3), 261120   ;;  %v524_v0 = vmov (!%p188_p3), 0.0   ;;  %v499_v1 = vld [vmem:[%s589_s1] sm:$0xff] (!%p188_p3)   ;;  %p228_p4 = scmp.lt.s32.totalorder (!%p188_p3), %s514_s12, 1  ;;  %vm525_vm1 = vmmov (!%p188_p3), 0   ;;  %vm274_vm2 = vcmask (!%p188_p3), 130048  }
   0x7   : > { %191 = sbr.rel (%p188_p3) target bundleno = 245 (0xf5), region = 32  ;;  %262 = vst.msk [vmem:[#allocation2] sm:$0xff] (!%p188_p3), %vm261_vm0, %v524_v0  ;;  %467 = vmatprep.subr.bf16.mxu0 (!%p188_p3), %v524_v0  ;;  %469 = vmatprep.mubr.msk.bf16.mxu0 (!%p188_p3), %vm525_vm1, %v524_v0  ;;  %v462_v10 = vld [vmem:[%s590_s2] ss:$0 sm:$0xff] (!%p188_p3) }
   0x8   : > { %468 = vmatpush3.bf16.msra.mxu0 (!%p188_p3), %v499_v1 }
   0xe   : > { %s597_s12 = smov (!%p228_p4, %s514_s12), 1  ;;  %v263_v4 = vld [vmem:[#allocation2] sm:$0xff] }
   0xf   : > { %s458_s18 = sshll.u32 %s597_s12, 3 }
  0x10   : > { %s234_s21 = scalar_lea.vmem %s588_s0, %s458_s18  ;;  %s255_s26 = scalar_lea.vmem %s591_s3, %s458_s18 }
  0x11   : > { %v264_v2 = vld [vmem:[%s234_s21] sm:$0xff] }
  0x12   : > { %v265_v3 = vpack.c.bf16 %v264_v2, %v264_v2 }
  0x14   : > { %470 = vmatmul.mubr.msk.bf16.vlgmr.msra.gmra.mrb[0].mxu0 %vm274_vm2, %v265_v3 }
  0xe7   : > { %v312_v5 = vpop.f32.mrb[0].mxu0 }
  0xe8   : > { %v318_v6 = vadd.f32 %v312_v5, %v263_v4  ;;  %v471_v7 = vpop.f32.mrb[1].mxu0 }
  0xe9   : > { %v315_v8 = vpop.f32.mrb[2].mxu0 }
  0xea   : > { %320 = vst.msk [vmem:[#allocation2] sm:$0xff] %vm261_vm0, %v318_v6  ;;  %v472_v9 = vpop.f32.mrb[3].mxu0 }
  0xf1   : > { %v324_v11 = vld [vmem:[#allocation2] sm:$0xff] }
  0xf2   : > { %v332_v12 = vadd.f32 %v462_v10, %v324_v11 }
  0xf4   : > { %333 = vst.msk [vmem:[%s255_s26] sm:$0xff] %vm261_vm0, %v332_v12 }
  0xf5 PF: > { %s13_s14 = sadd.s32 1, %s522_s14   ;;  %s592_s12 = smov %s518_s13 }
  0xf6   : > { %p10_p5 = scmp.ge.s32.totalorder %s13_s14, 4   ;;  %s593_s13 = smov %s595_s15 }
  0xf8   :  { %12 = sbr.rel (!%p10_p5) target bundleno = 2 (0x2), region = 76 }

// kernel: map_encoder_forward.10
= control target key start
LH: loop header
LB: loop body
LE: loop exit
PB: predicated region body
PF: predicated region fallthrough
CT: control target
= control target key end

     0   :  { %s590_s12 = smov 0   ;;  %s592_s13 = smov 0   ;;  %s650_s0 = inlined_call_operand.vmem [shape: f32[16,32], index: 0, kind: input, shape index: {}]   ;;  %s651_s1 = inlined_call_operand.vmem [shape: bf16[3,32,32], index: 1, kind: input, shape index: {}]   ;;  %s652_s2 = inlined_call_operand.vmem [shape: f32[3,1,32], index: 2, kind: input, shape index: {}]   ;;  %s653_s3 = inlined_call_operand.vmem [shape: bf16[3,16,32], index: 3, kind: output, shape index: {}]  }
   0x1   :  { %s594_s14 = smov 0   ;;  %s596_s15 = smov 0  }
   0x2   :  { %s598_s16 = smov 0  }
   0x3 LB: > { %s28_s17 = sadd.s32 1, %s558_s14  ;;  %s32_s18 = sadd.s32 1, %s562_s15  ;;  %s566_s16 = sphi %s598_s16, %s13_s16   ;;  %s562_s15 = sphi %s596_s15, %s657_s15   ;;  %s558_s14 = sphi %s594_s14, %s656_s14   ;;  %s554_s13 = sphi %s592_s13, %s655_s13   ;;  %s550_s12 = sphi %s590_s12, %s654_s12  }
   0x4   : > { %p30_p0 = scmp.ge.s32.totalorder %s28_s17, 3  ;;  %p460_p1 = scmp.ge.s32.totalorder %s566_s16, 1 }
   0x5   : > { %p187_p2 = scmp.lt.s32.totalorder %s566_s16, 7 }
   0x6   : > { %s659_s17 = smov (%p30_p0, %s28_s17), 0  ;;  %s661_s18 = smov (!%p30_p0, %s32_s18), %s562_s15 }
   0x7   : > { %p188_p3 = pnand %p460_p1, %p187_p2  ;;  %p34_p4 = scmp.ge.s32.totalorder %s661_s18, 2 }
   0x8   : > { %p236_p5 = scmp.lt.s32.totalorder (!%p188_p3), %s550_s12, 2  ;;  %p228_p6 = scmp.lt.s32.totalorder (!%p188_p3), %s554_s13, 1  ;;  %vm261_vm0 = vcmask (!%p188_p3), 261120   ;;  %v568_v0 = vmov (!%p188_p3), 0.0   ;;  %vm569_vm1 = vmmov (!%p188_p3), 0   ;;  %vm341_vm2 = vcmask (!%p188_p3), 257024  }
   0x9   : > { %s663_s18 = smov (%p34_p4, %s661_s18), 0  ;;  %191 = sbr.rel (%p188_p3) target bundleno = 254 (0xfe), region = 32 }
   0xa   : > { %476 = vmatprep.subr.bf16.mxu0 (!%p188_p3), %v568_v0  ;;  %480 = vmatprep.mubr.msk.bf16.mxu0 (!%p188_p3), %vm569_vm1, %v568_v0  ;;  %262 = vst.msk [vmem:[#allocation2] sm:$0xff] (!%p188_p3), %vm261_vm0, %v568_v0 }
  0x10   : > { %s665_s12 = smov (!%p236_p5, %s550_s12), 2  ;;  %s667_s13 = smov (!%p228_p6, %s554_s13), 1 }
  0x11   : > { %s472_s19 = sshll.u32 %s665_s12, 4  ;;  %s461_s23 = sshll.u32 %s667_s13, 3  ;;  %v263_v5 = vld [vmem:[#allocation2] sm:$0xff] }
  0x12   : > { %s243_s22 = scalar_lea.vmem %s651_s1, %s472_s19  ;;  %s234_s26 = scalar_lea.vmem %s650_s0, %s461_s23 }
  0x13   : > { %v526_v1 = vld [vmem:[%s243_s22] sm:$0xff]   ;;  %s464_s27 = sshll.u32 %s665_s12, 1  ;;  %v527_v2 = vld [vmem:[%s243_s22 + $0x8] sm:$0xff]   ;;  %s247_s4 = scalar_lea.vmem %s652_s2, %s665_s12 }
  0x14   : > { %s253_s28 = sadd.s32 %s464_s27, %s667_s13  ;;  %477 = vmatpush3.bf16.msra.mxu0 %v526_v1  ;;  %v264_v3 = vld [vmem:[%s234_s26] sm:$0xff] }
  0x15   : > { %478 = vmatprep.subr.bf16.mxu0 %v568_v0  ;;  %v265_v4 = vpack.c.bf16 %v264_v3, %v264_v3  ;;  %v469_v11 = vld [vmem:[%s247_s4] ss:$0 sm:$0xff]  ;;  %s465_s5 = sshll.u32 %s253_s28, 2 }
  0x16   : > { %s255_s8 = scalar_lea.vmem %s653_s3, %s465_s5 }
  0x18   : > { %479 = vmatpush3.bf16.msra.mxu0 %v527_v2 }
  0x1b   : > { %481 = vmatmul.mubr.msk.bf16.vlgmr.msra.gmra.mrb[0].mxu0 %vm261_vm0, %v265_v4 }
  0xee   : > { %v320_v6 = vpop.f32.mrb[0].mxu0 }
  0xef   : > { %v326_v7 = vadd.f32 %v320_v6, %v263_v5  ;;  %v482_v8 = vpop.f32.mrb[1].mxu0 }
  0xf0   : > { %v323_v9 = vpop.f32.mrb[2].mxu0 }
  0xf1   : > { %327 = vst.msk [vmem:[#allocation2] sm:$0xff] %vm261_vm0, %v326_v7  ;;  %v483_v10 = vpop.f32.mrb[3].mxu0 }
  0xf8   : > { %v331_v12 = vld [vmem:[#allocation2] sm:$0xff] }
  0xf9   : > { %v339_v13 = vadd.f32 %v469_v11, %v331_v12 }
  0xfb   : > { %v340_v14 = vpack.c.bf16 %v339_v13, %v339_v13 }
  0xfd   : > { %342 = vst.msk [vmem:[%s255_s8] sm:$0xf] %vm341_vm2, %v340_v14 }
  0xfe PF: > { %s13_s16 = sadd.s32 1, %s566_s16   ;;  %s654_s12 = smov %s558_s14 }
  0xff   : > { %p10_p7 = scmp.ge.s32.totalorder %s13_s16, 8   ;;  %s655_s13 = smov %s562_s15 }
 0x100   : > { %s656_s14 = smov %s659_s17  ;;  %s657_s15 = smov %s663_s18 }
 0x101   :  { %12 = sbr.rel (!%p10_p7) target bundleno = 3 (0x3), region = 76 }

// kernel: map_encoder_forward.13
= control target key start
LH: loop header
LB: loop body
LE: loop exit
PB: predicated region body
PF: predicated region fallthrough
CT: control target
= control target key end

     0   :  { %8 = vsyncpa [#allocation4], 0  ;;  %s597_s12 = smov 0   ;;  %s599_s13 = smov 0   ;;  %s679_s0 = inlined_call_operand.vmem [shape: f32[16,32], index: 0, kind: input, shape index: {}]   ;;  %s680_s1 = inlined_call_operand.hbm [shape: bf16[1,32,32], index: 1, kind: input, shape index: {}]   ;;  %s681_s2 = inlined_call_operand.vmem [shape: f32[1,1,32], index: 2, kind: input, shape index: {}]   ;;  %s682_s3 = inlined_call_operand.vmem [shape: bf16[1,16,32], index: 3, kind: output, shape index: {}]  }
   0x1   :  { %s601_s14 = smov 0  }
   0x2 LB: > { %s448_s15 = sadd.s32 4294967295, %s570_s14   ;;  %s33_s16 = sadd.s32 1, %s566_s13  ;;  %s570_s14 = sphi %s601_s14, %s14_s14   ;;  %s566_s13 = sphi %s599_s13, %s692_s13   ;;  %s562_s12 = sphi %s597_s12, %s691_s12  }
   0x3   : > { %p35_p0 = scmp.ge.s32.totalorder %s33_s16, 2  ;;  %p450_p1 = scmp.ge.s32.totalorder %s570_s14, 1 }
   0x4   : > { %p148_p2 = scmp.lt.s32.totalorder %s570_s14, 3  ;;  %p622_p4 = scmp.eq.s32.totalorder %s448_s15, 0 }
   0x5   : > { %s694_s16 = smov (%p35_p0, %s33_s16), 0  ;;  %s572_s19 = smov [#allocation3]  }
   0x6   : > { %p618_p3 = pnand %p450_p1, %p148_p2  ;;  %s165_s20 = sshll.u32 %s572_s19, 4  ;;  %s166_s20 = int_to_ptr.vmem [resolvable:$true] %s165_s20 }
   0x7   : > { %s687_s18 = scalar_select %p622_p4, 1, 0 }
   0x8   : > { %s686_s17 = scalar_select %p618_p3, 1, 0 }
   0x9   : > { %p479_p5 = pneg %p618_p3  ;;  %s516_s24 = scalar_lea.hbm %s680_s1, 256 }
   0xa   : > { %p517_p7 = scmp.ne.s32.totalorder %s680_s1, %s516_s24  ;;  %p523_p11 = scmp.lt.u32.totalorder %s516_s24, %s680_s1 }
   0xb   : > { %p630_p6 = pnand %p622_p4, %p479_p5 }
   0xd   : > { %p518_p8 = pneg %p630_p6 }
   0xf   : > { %p519_p9 = pnand %p518_p8, %p517_p7 }
  0x11   : > { %p520_p10 = pneg %p519_p9 }
  0x13   : > { %p525_p12 = pnand %p523_p11, %p520_p10 }
  0x15   : > { %528 = shalt.err (!%p525_p12)
}
  0x16   : > { %s529_s29 = scalar_lea.vmem %s166_s20, 256  ;;  %p537_p2 = scmp.lt.s32.totalorder %s166_s20, %s166_s20 }
  0x17   : > { %p530_p13 = scmp.ne.s32.totalorder %s166_s20, %s529_s29  ;;  %p538_p5 = scmp.lt.s32.totalorder %s529_s29, %s529_s29 }
  0x19   : > { %p532_p0 = pnand %p530_p13, %p518_p8  ;;  %p539_p4 = por %p538_p5, %p537_p2 }
  0x1b   : > { %p533_p1 = pneg %p532_p0 }
  0x1d   : > { %p540_p3 = pnand %p539_p4, %p533_p1 }
  0x1f   : > { %543 = shalt.err (!%p540_p3)
}
  0x20   : > { %s573_s30 = smov 64   ;;  %s574_s4 = smov 4  }
  0x21   : > { %482 = dma.hbm_to_vmem [thread:$0]  (!%p630_p6), %s680_s1, 256, %s166_s20, [#allocation4], %s573_s30, %s573_s30, %s574_s4  }
  0x22   : > { %p689_p7 = scmp.ne.s32.totalorder %s686_s17, 0 }
  0x23   : > { %p690_p9 = scmp.ne.s32.totalorder (!%p689_p7), %s687_s18, 0 }
  0x24   : > { %197 = sbr.rel (%p689_p7) target bundleno = 280 (0x118), region = 32 }
  0x2b   : > { %557 = dma.done.wait (%p690_p9), [#allocation4], 256  }
  0x2c   : > { %559 = vsyncadd (%p690_p9), [#allocation4], 4294967040  ;;  %p229_p3 = scmp.lt.s32.totalorder %s562_s12, 1  ;;  %vm253_vm0 = vcmask 261120   ;;  %v575_v0 = vmov 0.0   ;;  %vm576_vm1 = vmmov 0  }
  0x2d   : > { %467 = vmatprep.subr.bf16.mxu0 %v575_v0  ;;  %471 = vmatprep.mubr.msk.bf16.mxu0 %vm576_vm1, %v575_v0  ;;  %254 = vst.msk [vmem:[#allocation2] sm:$0xff] %vm253_vm0, %v575_v0  ;;  %v514_v1 = vld [vmem:[#allocation3] sm:$0xff]   ;;  %v515_v2 = vld [vmem:[#allocation3 + $0x8] sm:$0xff]   ;;  %v461_v11 = vld [vmem:[%s681_s2] ss:$0 sm:$0xff]  ;;  %vm333_vm2 = vcmask 257024  }
  0x2e   : > { %s696_s12 = smov (!%p229_p3, %s562_s12), 1  ;;  %468 = vmatpush3.bf16.msra.mxu0 %v514_v1 }
  0x2f   : > { %s456_s7 = sshll.u32 %s696_s12, 3  ;;  %469 = vmatprep.subr.bf16.mxu0 %v575_v0  ;;  %s457_s17 = sshll.u32 %s696_s12, 2 }
  0x30   : > { %s235_s10 = scalar_lea.vmem %s679_s0, %s456_s7  ;;  %s247_s20 = scalar_lea.vmem %s682_s3, %s457_s17 }
  0x31   : > { %v256_v3 = vld [vmem:[%s235_s10] sm:$0xff] }
  0x32   : > { %v257_v4 = vpack.c.bf16 %v256_v3, %v256_v3  ;;  %470 = vmatpush3.bf16.msra.mxu0 %v515_v2 }
  0x34   : > { %v255_v5 = vld [vmem:[#allocation2] sm:$0xff] }
  0x35   : > { %472 = vmatmul.mubr.msk.bf16.vlgmr.msra.gmra.mrb[0].mxu0 %vm253_vm0, %v257_v4 }
 0x108   : > { %v312_v6 = vpop.f32.mrb[0].mxu0 }
 0x109   : > { %v318_v7 = vadd.f32 %v312_v6, %v255_v5  ;;  %v473_v8 = vpop.f32.mrb[1].mxu0 }
 0x10a   : > { %v315_v9 = vpop.f32.mrb[2].mxu0 }
 0x10b   : > { %319 = vst.msk [vmem:[#allocation2] sm:$0xff] %vm253_vm0, %v318_v7  ;;  %v474_v10 = vpop.f32.mrb[3].mxu0 }
 0x112   : > { %v323_v12 = vld [vmem:[#allocation2] sm:$0xff] }
 0x113   : > { %v331_v13 = vadd.f32 %v461_v11, %v323_v12 }
 0x115   : > { %v332_v14 = vpack.c.bf16 %v331_v13, %v331_v13 }
 0x117   : > { %334 = vst.msk [vmem:[%s247_s20] sm:$0xf] %vm333_vm2, %v332_v14 }
 0x118 PF: > { %s14_s14 = sadd.s32 1, %s570_s14   ;;  %s691_s12 = smov %s566_s13 }
 0x119   : > { %p11_p4 = scmp.ge.s32.totalorder %s14_s14, 4   ;;  %s692_s13 = smov %s694_s16 }
 0x11b   :  { %13 = sbr.rel (!%p11_p4) target bundleno = 2 (0x2), region = 79 }
 0x122   :  { %362 = vsyncpa [#allocation4], 1 }
 0x123   :  { %364 = vsyncpa [#allocation4 + $0x1], 1 }

// kernel: map_encoder_forward.14
= control target key start
LH: loop header
LB: loop body
LE: loop exit
PB: predicated region body
PF: predicated region fallthrough
CT: control target
= control target key end

     0   :  { %s590_s12 = smov 0   ;;  %s592_s13 = smov 0   ;;  %s650_s0 = inlined_call_operand.vmem [shape: f32[16,32], index: 0, kind: input, shape index: {}]   ;;  %s651_s1 = inlined_call_operand.vmem [shape: bf16[2,32,32], index: 1, kind: input, shape index: {}]   ;;  %s652_s2 = inlined_call_operand.vmem [shape: f32[2,1,32], index: 2, kind: input, shape index: {}]   ;;  %s653_s3 = inlined_call_operand.vmem [shape: bf16[2,16,32], index: 3, kind: output, shape index: {}]  }
   0x1   :  { %s594_s14 = smov 0   ;;  %s596_s15 = smov 0  }
   0x2   :  { %s598_s16 = smov 0  }
   0x3 LB: > { %s28_s17 = sadd.s32 1, %s558_s14  ;;  %s32_s18 = sadd.s32 1, %s562_s15  ;;  %s566_s16 = sphi %s598_s16, %s13_s16   ;;  %s562_s15 = sphi %s596_s15, %s657_s15   ;;  %s558_s14 = sphi %s594_s14, %s656_s14   ;;  %s554_s13 = sphi %s592_s13, %s655_s13   ;;  %s550_s12 = sphi %s590_s12, %s654_s12  }
   0x4   : > { %p30_p0 = scmp.ge.s32.totalorder %s28_s17, 2  ;;  %p460_p1 = scmp.ge.s32.totalorder %s566_s16, 1 }
   0x5   : > { %p187_p2 = scmp.lt.s32.totalorder %s566_s16, 5 }
   0x6   : > { %s659_s17 = smov (%p30_p0, %s28_s17), 0  ;;  %s661_s18 = smov (!%p30_p0, %s32_s18), %s562_s15 }
   0x7   : > { %p188_p3 = pnand %p460_p1, %p187_p2  ;;  %p34_p4 = scmp.ge.s32.totalorder %s661_s18, 2 }
   0x8   : > { %p236_p5 = scmp.lt.s32.totalorder (!%p188_p3), %s550_s12, 1  ;;  %p228_p6 = scmp.lt.s32.totalorder (!%p188_p3), %s554_s13, 1  ;;  %vm261_vm0 = vcmask (!%p188_p3), 261120   ;;  %v568_v0 = vmov (!%p188_p3), 0.0   ;;  %vm569_vm1 = vmmov (!%p188_p3), 0   ;;  %vm341_vm2 = vcmask (!%p188_p3), 257024  }
   0x9   : > { %s663_s18 = smov (%p34_p4, %s661_s18), 0  ;;  %191 = sbr.rel (%p188_p3) target bundleno = 254 (0xfe), region = 32 }
   0xa   : > { %476 = vmatprep.subr.bf16.mxu0 (!%p188_p3), %v568_v0  ;;  %480 = vmatprep.mubr.msk.bf16.mxu0 (!%p188_p3), %vm569_vm1, %v568_v0  ;;  %262 = vst.msk [vmem:[#allocation2] sm:$0xff] (!%p188_p3), %vm261_vm0, %v568_v0 }
  0x10   : > { %s665_s12 = smov (!%p236_p5, %s550_s12), 1  ;;  %s667_s13 = smov (!%p228_p6, %s554_s13), 1 }
  0x11   : > { %s472_s19 = sshll.u32 %s665_s12, 4  ;;  %s461_s23 = sshll.u32 %s667_s13, 3  ;;  %v263_v5 = vld [vmem:[#allocation2] sm:$0xff] }
  0x12   : > { %s243_s22 = scalar_lea.vmem %s651_s1, %s472_s19  ;;  %s234_s26 = scalar_lea.vmem %s650_s0, %s461_s23 }
  0x13   : > { %v526_v1 = vld [vmem:[%s243_s22] sm:$0xff]   ;;  %s464_s27 = sshll.u32 %s665_s12, 1  ;;  %v527_v2 = vld [vmem:[%s243_s22 + $0x8] sm:$0xff]   ;;  %s247_s4 = scalar_lea.vmem %s652_s2, %s665_s12 }
  0x14   : > { %s253_s28 = sadd.s32 %s464_s27, %s667_s13  ;;  %477 = vmatpush3.bf16.msra.mxu0 %v526_v1  ;;  %v264_v3 = vld [vmem:[%s234_s26] sm:$0xff] }
  0x15   : > { %478 = vmatprep.subr.bf16.mxu0 %v568_v0  ;;  %v265_v4 = vpack.c.bf16 %v264_v3, %v264_v3  ;;  %v469_v11 = vld [vmem:[%s247_s4] ss:$0 sm:$0xff]  ;;  %s465_s5 = sshll.u32 %s253_s28, 2 }
  0x16   : > { %s255_s8 = scalar_lea.vmem %s653_s3, %s465_s5 }
  0x18   : > { %479 = vmatpush3.bf16.msra.mxu0 %v527_v2 }
  0x1b   : > { %481 = vmatmul.mubr.msk.bf16.vlgmr.msra.gmra.mrb[0].mxu0 %vm261_vm0, %v265_v4 }
  0xee   : > { %v320_v6 = vpop.f32.mrb[0].mxu0 }
  0xef   : > { %v326_v7 = vadd.f32 %v320_v6, %v263_v5  ;;  %v482_v8 = vpop.f32.mrb[1].mxu0 }
  0xf0   : > { %v323_v9 = vpop.f32.mrb[2].mxu0 }
  0xf1   : > { %327 = vst.msk [vmem:[#allocation2] sm:$0xff] %vm261_vm0, %v326_v7  ;;  %v483_v10 = vpop.f32.mrb[3].mxu0 }
  0xf8   : > { %v331_v12 = vld [vmem:[#allocation2] sm:$0xff] }
  0xf9   : > { %v339_v13 = vadd.f32 %v469_v11, %v331_v12 }
  0xfb   : > { %v340_v14 = vpack.c.bf16 %v339_v13, %v339_v13 }
  0xfd   : > { %342 = vst.msk [vmem:[%s255_s8] sm:$0xf] %vm341_vm2, %v340_v14 }
  0xfe PF: > { %s13_s16 = sadd.s32 1, %s566_s16   ;;  %s654_s12 = smov %s558_s14 }
  0xff   : > { %p10_p7 = scmp.ge.s32.totalorder %s13_s16, 6   ;;  %s655_s13 = smov %s562_s15 }
 0x100   : > { %s656_s14 = smov %s659_s17  ;;  %s657_s15 = smov %s663_s18 }
 0x101   :  { %12 = sbr.rel (!%p10_p7) target bundleno = 3 (0x3), region = 76 }

// kernel: map_encoder_forward.12
= control target key start
LH: loop header
LB: loop body
LE: loop exit
PB: predicated region body
PF: predicated region fallthrough
CT: control target
= control target key end

     0   :  { %s517_s21 = smov 0   ;;  %s560_s0 = inlined_call_operand.vmem [shape: bf16[16,32], index: 0, kind: input, shape index: {}]   ;;  %s561_s1 = inlined_call_operand.vmem [shape: bf16[32,32], index: 1, kind: input, shape index: {}]   ;;  %s562_s2 = inlined_call_operand.vmem [shape: f32[1,32], index: 2, kind: input, shape index: {}]   ;;  %s563_s3 = inlined_call_operand.vmem [shape: f32[16,32], index: 3, kind: input, shape index: {}]   ;;  %s564_s4 = inlined_call_operand.vmem [shape: f32[1,32], index: 4, kind: input, shape index: {}]   ;;  %s565_s5 = inlined_call_operand.vmem [shape: f32[1,32], index: 5, kind: input, shape index: {}]   ;;  %s566_s6 = inlined_call_operand.vmem [shape: f32[16,32], index: 6, kind: output, shape index: {}]  }
   0x1 LB: > { %s431_s22 = sadd.s32 4294967295, %s478_s21   ;;  %p435_p0 = scmp.ge.s32.totalorder %s478_s21, 1  ;;  %s478_s21 = sphi %s517_s21, %s16_s21  }
   0x2   : > { %p220_p1 = scmp.lt.s32.totalorder %s478_s21, 3 }
   0x4   : > { %p221_p2 = pnand %p435_p0, %p220_p1 }
   0x5   : > { %v468_v0 = vld [vmem:[%s561_s1] sm:$0xff] (!%p221_p2)   ;;  %v480_v1 = vmov (!%p221_p2), 0.0   ;;  %v469_v2 = vld [vmem:[%s561_s1 + $0x8] sm:$0xff] (!%p221_p2)   ;;  %vm481_vm0 = vmmov (!%p221_p2), 0   ;;  %p252_p3 = scmp.lt.s32.totalorder (!%p221_p2), %s431_s22, 1  ;;  %vm289_vm1 = vcmask (!%p221_p2), 261120  }
   0x6   : > { %224 = sbr.rel (%p221_p2) target bundleno = 547 (0x223), region = 44  ;;  %450 = vmatprep.subr.bf16.mxu0 (!%p221_p2), %v480_v1  ;;  %454 = vmatprep.mubr.msk.bf16.mxu0 (!%p221_p2), %vm481_vm0, %v480_v1  ;;  %v439_v4 = vld [vmem:[%s562_s2] ss:$0 sm:$0xff] (!%p221_p2) }
   0x7   : > { %451 = vmatpush3.bf16.msra.mxu0 (!%p221_p2), %v468_v0  ;;  %v443_v22 = vld [vmem:[%s564_s4] ss:$0 sm:$0xff] (!%p221_p2) }
   0x8   : > { %452 = vmatprep.subr.bf16.mxu0 (!%p221_p2), %v480_v1  ;;  %v444_v24 = vld [vmem:[%s565_s5] ss:$0 sm:$0xff] (!%p221_p2) }
   0xb   : > { %453 = vmatpush3.bf16.msra.mxu0 (!%p221_p2), %v469_v2 }
   0xd   : > { %s568_s22 = smov (!%p252_p3, %s431_s22), 1 }
   0xe   : > { %s436_s27 = sshll.u32 %s568_s22, 2  ;;  %s437_s7 = sshll.u32 %s568_s22, 3 }
   0xf   : > { %s255_s30 = scalar_lea.vmem %s560_s0, %s436_s27  ;;  %s259_s10 = scalar_lea.vmem %s563_s3, %s437_s7 }
  0x10   : > { %v265_v3 = vld [vmem:[%s255_s30] sm:$0xf]  ;;  %s263_s19 = scalar_lea.vmem %s566_s6, %s437_s7 }
  0x11   : > { %455 = vmatmul.mubr.msk.bf16.vlgmr.msra.gmra.mrb[0].mxu0 %vm289_vm1, %v265_v3  ;;  %v333_v6 = vld [vmem:[%s259_s10] sm:$0xff] }
  0xe4   : > { %v327_v5 = vpop.f32.mrb[0].mxu0 }
  0xe5   : > { %v328_v7 = vadd.f32 %v439_v4, %v327_v5  ;;  %v456_v8 = vpop.f32.mrb[1].mxu0 }
  0xe6   : > { %v330_v9 = vpop.f32.mrb[2].mxu0 }
  0xe7   : > { %v457_v10 = vpop.f32.mrb[3].mxu0  ;;  %v334_v11 = vadd.f32 %v333_v6, %v328_v7 }
  0xe9   : > { %v335_v12 = vsel %vm289_vm1, %v334_v11, 0.0 }
  0xea   : > { %336 = vadd.xlane.f32.xlu0 %v335_v12 }
 0x177   : > { %v337_v13 = vpop.xlane.xlu0 %336 }
 0x178   : > { %v339_v14 = vmul.f32 0.03125, %v337_v13 }
 0x17a   : > { %v340_v15 = vsub.f32 %v334_v11, %v339_v14 }
 0x17c   : > { %v341_v16 = vmul.f32 %v340_v15, %v340_v15 }
 0x17e   : > { %v342_v17 = vsel %vm289_vm1, %v341_v16, 0.0 }
 0x17f   : > { %343 = vadd.xlane.f32.xlu0 %v342_v17 }
 0x20c   : > { %v344_v18 = vpop.xlane.xlu0 %343 }
 0x20d   : > { %v345_v19 = vmul.f32 0.03125, %v344_v18 }
 0x20f   : > { %v346_v20 = vadd.f32 1e-05, %v345_v19 }
 0x211   : > { %470 = vrsqrt.f32 %v346_v20 }
 0x21b   : > { %v471_v21 = vpop.eup %470 }
 0x21c   : > { %v348_v23 = vmul.f32 %v471_v21, %v340_v15 }
 0x21e   : > { %v356_v25 = vmul.f32 %v443_v22, %v348_v23 }
 0x220   : > { %v364_v26 = vadd.f32 %v444_v24, %v356_v25 }
 0x222   : > { %365 = vst.msk [vmem:[%s263_s19] sm:$0xff] %vm289_vm1, %v364_v26 }
 0x223 PF: > { %s16_s21 = sadd.s32 1, %s478_s21  }
 0x224   : > { %p13_p4 = scmp.ge.s32.totalorder %s16_s21, 4  }
 0x226   :  { %15 = sbr.rel (!%p13_p4) target bundleno = 1 (0x1), region = 77 }

// kernel: map_encoder_forward.11
= control target key start
LH: loop header
LB: loop body
LE: loop exit
PB: predicated region body
PF: predicated region fallthrough
CT: control target
= control target key end

     0   :  { %s1001_s12 = smov 0   ;;  %s1003_s13 = smov 0   ;;  %s1112_s0 = inlined_call_operand.vmem [shape: bf16[3,2,8,32], index: 0, kind: input, shape index: {}, may-alias: {0,1,2}]   ;;  %s1113_s1 = inlined_call_operand.vmem [shape: bf16[3,2,8,32], index: 1, kind: input, shape index: {}, may-alias: {0,1,2}]   ;;  %s1114_s2 = inlined_call_operand.vmem [shape: bf16[3,2,8,32], index: 2, kind: input, shape index: {}, may-alias: {0,1,2}]   ;;  %s1115_s3 = inlined_call_operand.vmem [shape: bf16[2,8,32], index: 3, kind: output, shape index: {}]  }
   0x1   :  { %s1005_s14 = smov 0  }
   0x2 LB: > { %s25_s15 = sadd.s32 1, %s967_s13  ;;  %p814_p0 = scmp.ge.s32.totalorder %s971_s14, 1  ;;  %s971_s14 = sphi %s1005_s14, %s13_s14   ;;  %s967_s13 = sphi %s1003_s13, %s1117_s13   ;;  %s963_s12 = sphi %s1001_s12, %s1116_s12  }
   0x3   : > { %p27_p1 = scmp.ge.s32.totalorder %s25_s15, 2  ;;  %p175_p2 = scmp.lt.s32.totalorder %s971_s14, 3 }
   0x5   : > { %s1119_s15 = smov (%p27_p1, %s25_s15), 0  ;;  %p176_p3 = pnand %p814_p0, %p175_p2 }
   0x6   : > { %p213_p4 = scmp.lt.s32.totalorder (!%p176_p3), %s963_s12, 1  ;;  %v973_v0 = vmov (!%p176_p3), 0.0   ;;  %vm974_vm0 = vmmov (!%p176_p3), 0   ;;  %vm241_vm1 = vcmask (!%p176_p3), 64512   ;;  %s975_s23 = smov (!%p176_p3), 120   ;;  %vm301_vm2 = vcmask (!%p176_p3), 1043456  }
   0x7   : > { %179 = sbr.rel (%p176_p3) target bundleno = 1164 (0x48c), region = 32  ;;  %850 = vmatprep.subr.bf16.mxu0 (!%p176_p3), %v973_v0  ;;  %852 = vmatprep.mubr.msk.bf16.mxu0 (!%p176_p3), %vm974_vm0, %v973_v0  ;;  %s976_s24 = smov (!%p176_p3), 112   ;;  %vm699_vm3 = vcmask (!%p176_p3), 130048   ;;  %vm701_vm4 = vcmask (!%p176_p3), 195584   ;;  %vm704_vm5 = vcmask (!%p176_p3), 257024  }
   0x8   : > { %856 = vmatprep.subr.bf16.mxu1 (!%p176_p3), %v973_v0  ;;  %858 = vmatprep.mubr.msk.bf16.mxu1 (!%p176_p3), %vm974_vm0, %v973_v0  ;;  %s977_s25 = smov (!%p176_p3), 104   ;;  %s978_s29 = smov (!%p176_p3), 8  }
   0x9   : > { %s979_s30 = smov (!%p176_p3), 16   ;;  %s980_s4 = smov (!%p176_p3), 24  }
   0xe   : > { %s1121_s12 = smov (!%p213_p4, %s963_s12), 1 }
   0xf   : > { %s1025_s16 = sshll.u32 %s1121_s12, 2 }
  0x10   : > { %s756_s19 = scalar_lea.vmem %s1113_s1, %s1025_s16  ;;  %s219_s22 = scalar_lea.vmem %s1112_s0, %s1025_s16 }
  0x11   : > { %v819_v1 = vld [vmem:[%s756_s19 + $0x8] sm:$0xf]  ;;  %v238_v3 = vld [vmem:[%s219_s22] sm:$0xf]  ;;  %s759_s28 = scalar_lea.vmem %s1114_s2, %s1025_s16  ;;  %s236_s7 = scalar_lea.vmem %s1115_s3, %s1025_s16 }
  0x12   : > { %v246_v2 = vsel %vm241_vm1, %v819_v1, 0  ;;  %v823_v4 = vcombine.low %v238_v3, %v238_v3  ;;  %v824_v5 = vcombine.low %v819_v1, %v819_v1  ;;  %v820_v11 = vld [vmem:[%s759_s28 + $0x10] sm:$0xf] }
  0x13   : > { %851 = vmatpush3.bf16.xpose.msra.mxu0 %v246_v2  ;;  %v303_v12 = vsel %vm301_vm2, %v820_v11, 0  ;;  %v826_v41 = vcombine.low %v820_v11, %v820_v11 }
  0x14   : > { %868 = vmatprep.subr.bf16.mxu0 %v973_v0  ;;  %350 = vrot.lane.b32.xlu1 %v823_v4, %s975_s23 }
  0x15   : > { %857 = vmatpush3.bf16.msra.mxu1 %v303_v12 }
  0x16   : > { %862 = vmatprep.subr.bf16.mxu1 %v973_v0 }
  0x18   : > { %468 = vrot.lane.b32.xlu1 %v824_v5, %s976_s24 }
  0x1a   : > { %853 = vmatmul.mubr.msk.bf16.vlgmr.msra.gmra.mrb[0].mxu0 %vm241_vm1, %v238_v3 }
  0x1b   : > { %870 = vmatprep.mubr.msk.bf16.mxu0 %vm974_vm0, %v973_v0 }
  0x1c   : > { %466 = vrot.lane.b32.xlu1 %v823_v4, %s976_s24 }
  0x20   : > { %578 = vrot.lane.b32.xlu1 %v824_v5, %s977_s25 }
  0x24   : > { %576 = vrot.lane.b32.xlu1 %v823_v4, %s977_s25 }
  0x86   : > { %v351_v18 = vpop.permute.xlu1 %350 }
  0x8a   : > { %v469_v21 = vpop.permute.xlu1 %468 }
  0x8b   : > { %v474_v22 = vsel %vm241_vm1, %v469_v21, 0 }
  0x8e   : > { %v467_v23 = vpop.permute.xlu1 %466 }
  0x92   : > { %v579_v24 = vpop.permute.xlu1 %578 }
  0x93   : > { %v584_v25 = vsel %vm241_vm1, %v579_v24, 0 }
  0x96   : > { %v577_v26 = vpop.permute.xlu1 %576 }
  0xed   : > { %v282_v6 = vpop.f32.mrb[0].mxu0 }
  0xee   : > { %v854_v7 = vpop.f32.mrb[1].mxu0  ;;  %v288_v8 = vsel %vm241_vm1, %v282_v6, -inf }
  0xef   : > { %289 = vmax.xlane.f32.xlu0 %v288_v8  ;;  %v285_v9 = vpop.f32.mrb[2].mxu0 }
  0xf0   : > { %v855_v10 = vpop.f32.mrb[3].mxu0 }
 0x105   : > { %355 = vrot.lane.b32.xlu0 %v824_v5, %s975_s23 }
 0x17c   : > { %v290_v13 = vpop.xlane.xlu0 %289 }
 0x17d   : > { %v291_v14 = vsub.f32 %v282_v6, %v290_v13 }
 0x17f   : > { %v292_v15 = vmul.f32 1.442695, %v291_v14 }
 0x180   : > { %v356_v16 = vpop.permute.xlu0 %355 }
 0x181   : > { %933 = vpow2.f32 %v292_v15  ;;  %v361_v19 = vsel %vm241_vm1, %v356_v16, 0 }
 0x18b   : > { %v1053_v17 = vpop.eup %933 }
 0x18c   : > { %v297_v20 = vpack.c.bf16 %v1053_v17, %v1053_v17  ;;  %v294_v8 = vsel %vm241_vm1, %v1053_v17, 0.0 }
 0x18e   : > { %859 = vmatmul.mubr.msk.bf16.vlgmr.msra.gmra.mrb[0].mxu1 %vm241_vm1, %v297_v20 }
 0x18f   : > { %863 = vmatpush3.bf16.xpose.msra.mxu1 %v361_v19  ;;  %864 = vmatprep.mubr.msk.bf16.mxu1 %vm974_vm0, %v973_v0 }
 0x190   : > { %874 = vmatprep.subr.bf16.mxu1 %v973_v0 }
 0x196   : > { %865 = vmatmul.mubr.msk.bf16.vlgmr.msra.gmra.mrb[4].mxu1 %vm241_vm1, %v351_v18 }
 0x197   : > { %875 = vmatpush3.bf16.xpose.msra.mxu1 %v474_v22  ;;  %876 = vmatprep.mubr.msk.bf16.mxu1 %vm974_vm0, %v973_v0 }
 0x198   : > { %886 = vmatprep.subr.bf16.mxu1 %v973_v0 }
 0x19e   : > { %877 = vmatmul.mubr.msk.bf16.vlgmr.msra.gmra.mrb[8].mxu1 %vm241_vm1, %v467_v23 }
 0x19f   : > { %887 = vmatpush3.bf16.xpose.msra.mxu1 %v584_v25  ;;  %888 = vmatprep.mubr.msk.bf16.mxu1 %vm974_vm0, %v973_v0 }
 0x1a6   : > { %889 = vmatmul.mubr.msk.bf16.vlgmr.msra.gmra.mrb[12].mxu1 %vm241_vm1, %v577_v26 }
 0x261   : > { %v1072_v27 = vpop.f32.mrb[0].mxu1 }
 0x262   : > { %v860_v28 = vpop.f32.mrb[1].mxu1 }
 0x263   : > { %v342_v29 = vpop.f32.mrb[2].mxu1 }
 0x264   : > { %v861_v30 = vpop.f32.mrb[3].mxu1 }
 0x269   : > { %v397_v31 = vpop.f32.mrb[4].mxu1 }
 0x26a   : > { %v866_v32 = vpop.f32.mrb[5].mxu1  ;;  %v403_v33 = vsel %vm241_vm1, %v397_v31, -inf }
 0x26b   : > { %404 = vmax.xlane.f32.xlu1 %v403_v33  ;;  %v400_v34 = vpop.f32.mrb[6].mxu1 }
 0x26c   : > { %v867_v35 = vpop.f32.mrb[7].mxu1 }
 0x271   : > { %v510_v36 = vpop.f32.mrb[8].mxu1 }
 0x272   : > { %v516_v37 = vsel %vm241_vm1, %v510_v36, -inf  ;;  %v878_v38 = vpop.f32.mrb[9].mxu1 }
 0x273   : > { %517 = vmax.xlane.f32.xlu0 %v516_v37  ;;  %v513_v39 = vpop.f32.mrb[10].mxu1 }
 0x274   : > { %v879_v40 = vpop.f32.mrb[11].mxu1 }
 0x279   : > { %v620_v42 = vpop.f32.mrb[12].mxu1 }
 0x27a   : > { %v890_v43 = vpop.f32.mrb[13].mxu1  ;;  %v626_v46 = vsel %vm241_vm1, %v620_v42, -inf }
 0x27b   : > { %v623_v44 = vpop.f32.mrb[14].mxu1 }
 0x27c   : > { %526 = vrot.lane.b32.xlu1 %v826_v41, %s976_s24  ;;  %v891_v45 = vpop.f32.mrb[15].mxu1 }
 0x289   : > { %416 = vrot.lane.b32.xlu0 %v826_v41, %s975_s23 }
 0x2a0   : > { %627 = vmax.xlane.f32.xlu1 %v626_v46 }
 0x2b1   : > { %636 = vrot.lane.b32.xlu1 %v826_v41, %s977_s25 }
 0x2f8   : > { %v405_v47 = vpop.xlane.xlu1 %404 }
 0x2f9   : > { %v406_v48 = vsub.f32 %v397_v31, %v405_v47 }
 0x2fb   : > { %v407_v49 = vmul.f32 1.442695, %v406_v48 }
 0x2fc   : > { %v527_v56 = vpop.permute.xlu1 %526 }
 0x2fd   : > { %935 = vpow2.f32 %v407_v49  ;;  %v532_v59 = vsel %vm301_vm2, %v527_v56, 0 }
 0x300   : > { %v518_v50 = vpop.xlane.xlu0 %517 }
 0x301   : > { %v519_v51 = vsub.f32 %v510_v36, %v518_v50 }
 0x303   : > { %v520_v52 = vmul.f32 1.442695, %v519_v51 }
 0x304   : > { %v417_v53 = vpop.permute.xlu0 %416 }
 0x305   : > { %937 = vpow2.f32 %v520_v52  ;;  %v422_v54 = vsel %vm301_vm2, %v417_v53, 0 }
 0x306   : > { %869 = vmatpush3.bf16.msra.mxu0 %v422_v54 }
 0x307   : > { %v936_v55 = vpop.eup %935  ;;  %880 = vmatprep.subr.bf16.mxu0 %v973_v0 }
 0x308   : > { %v409_v57 = vsel %vm241_vm1, %v936_v55, 0.0  ;;  %v412_v58 = vpack.c.bf16 %v936_v55, %v936_v55 }
 0x309   : > { %410 = vadd.xlane.f32.xlu0 %v409_v57 }
 0x30a   : > { %871 = vmatmul.mubr.msk.bf16.vlgmr.msra.gmra.mrb[4].mxu0 %vm241_vm1, %v412_v58 }
 0x30b   : > { %881 = vmatpush3.bf16.msra.mxu0 %v532_v59  ;;  %882 = vmatprep.mubr.msk.bf16.mxu0 %vm974_vm0, %v973_v0 }
 0x30c   : > { %892 = vmatprep.subr.bf16.mxu0 %v973_v0 }
 0x30f   : > { %v938_v60 = vpop.eup %937 }
 0x310   : > { %v522_v61 = vsel %vm241_vm1, %v938_v60, 0.0  ;;  %v525_v62 = vpack.c.bf16 %v938_v60, %v938_v60 }
 0x311   : > { %523 = vadd.xlane.f32.xlu1 %v522_v61 }
 0x312   : > { %883 = vmatmul.mubr.msk.bf16.vlgmr.msra.gmra.mrb[8].mxu0 %vm241_vm1, %v525_v62 }
 0x313   : > { %894 = vmatprep.mubr.msk.bf16.mxu0 %vm974_vm0, %v973_v0 }
 0x32d   : > { %v628_v63 = vpop.xlane.xlu1 %627 }
 0x32e   : > { %v629_v1 = vsub.f32 %v620_v42, %v628_v63 }
 0x330   : > { %v630_v2 = vmul.f32 1.442695, %v629_v1 }
 0x331   : > { %v637_v3 = vpop.permute.xlu1 %636 }
 0x332   : > { %939 = vpow2.f32 %v630_v2  ;;  %v642_v4 = vsel %vm301_vm2, %v637_v3, 0 }
 0x333   : > { %893 = vmatpush3.bf16.msra.mxu0 %v642_v4 }
 0x33c   : > { %v940_v5 = vpop.eup %939 }
 0x33d   : > { %v632_v6 = vsel %vm241_vm1, %v940_v5, 0.0  ;;  %v635_v7 = vpack.c.bf16 %v940_v5, %v940_v5 }
 0x33e   : > { %633 = vadd.xlane.f32.xlu0 %v632_v6 }
 0x33f   : > { %895 = vmatmul.mubr.msk.bf16.vlgmr.msra.gmra.mrb[12].mxu0 %vm241_vm1, %v635_v7 }
 0x342   : > { %295 = vadd.xlane.f32.xlu0 %v294_v8 }
 0x396   : > { %v411_v0 = vpop.xlane.xlu0 %410 }
 0x397   : > { %941 = vrcp.f32 %v411_v0 }
 0x39e   : > { %v524_v9 = vpop.xlane.xlu1 %523 }
 0x39f   : > { %943 = vrcp.f32 %v524_v9 }
 0x3a1   : > { %v942_v10 = vpop.eup %941 }
 0x3a9   : > { %v944_v16 = vpop.eup %943 }
 0x3cb   : > { %v634_v22 = vpop.xlane.xlu0 %633 }
 0x3cc   : > { %945 = vrcp.f32 %v634_v22 }
 0x3cf   : > { %v296_v30 = vpop.xlane.xlu0 %295 }
 0x3d0   : > { %947 = vrcp.f32 %v296_v30 }
 0x3d6   : > { %v946_v23 = vpop.eup %945 }
 0x3da   : > { %v948_v31 = vpop.eup %947 }
 0x3db   : > { %v346_v33 = vmul.f32 %v948_v31, %v1072_v27 }
 0x3dd   : > { %v458_v11 = vpop.f32.mrb[4].mxu0 }
 0x3de   : > { %v465_v12 = vmul.f32 %v942_v10, %v458_v11  ;;  %v872_v13 = vpop.f32.mrb[5].mxu0 }
 0x3df   : > { %v461_v14 = vpop.f32.mrb[6].mxu0 }
 0x3e0   : > { %687 = vrot.lane.b32.xlu1 %v465_v12, %s978_s29  ;;  %v873_v15 = vpop.f32.mrb[7].mxu0 }
 0x3e5   : > { %v568_v18 = vpop.f32.mrb[8].mxu0 }
 0x3e6   : > { %v575_v19 = vmul.f32 %v944_v16, %v568_v18  ;;  %v884_v20 = vpop.f32.mrb[9].mxu0 }
 0x3e7   : > { %v571_v21 = vpop.f32.mrb[10].mxu0 }
 0x3e8   : > { %691 = vrot.lane.b32.xlu0 %v575_v19, %s979_s30  ;;  %v885_v17 = vpop.f32.mrb[11].mxu0 }
 0x412   : > { %v678_v24 = vpop.f32.mrb[12].mxu0 }
 0x413   : > { %v685_v25 = vmul.f32 %v946_v23, %v678_v24  ;;  %v896_v26 = vpop.f32.mrb[13].mxu0 }
 0x414   : > { %v681_v28 = vpop.f32.mrb[14].mxu0 }
 0x415   : > { %695 = vrot.lane.b32.xlu1 %v685_v25, %s980_s4  ;;  %v897_v29 = vpop.f32.mrb[15].mxu0 }
 0x452   : > { %v688_v32 = vpop.permute.xlu1 %687 }
 0x453   : > { %v698_v35 = vsel %vm241_vm1, %v346_v33, %v688_v32 }
 0x45a   : > { %v692_v34 = vpop.permute.xlu0 %691 }
 0x45b   : > { %v700_v36 = vsel %vm699_vm3, %v698_v35, %v692_v34 }
 0x487   : > { %v696_v37 = vpop.permute.xlu1 %695 }
 0x488   : > { %v702_v38 = vsel %vm701_vm4, %v700_v36, %v696_v37 }
 0x489   : > { %v703_v39 = vpack.c.bf16 %v702_v38, %v702_v38 }
 0x48b   : > { %705 = vst.msk [vmem:[%s236_s7] sm:$0xf] %vm704_vm5, %v703_v39 }
 0x48c PF: > { %s13_s14 = sadd.s32 1, %s971_s14   ;;  %s1116_s12 = smov %s967_s13 }
 0x48d   : > { %p10_p5 = scmp.ge.s32.totalorder %s13_s14, 4   ;;  %s1117_s13 = smov %s1119_s15 }
 0x48f   :  { %12 = sbr.rel (!%p10_p5) target bundleno = 2 (0x2), region = 68 }

// kernel: map_encoder_forward.15
= control target key start
LH: loop header
LB: loop body
LE: loop exit
PB: predicated region body
PF: predicated region fallthrough
CT: control target
= control target key end

     0   :  { %s994_s12 = smov 0   ;;  %s996_s13 = smov 0   ;;  %s1105_s0 = inlined_call_operand.vmem [shape: bf16[1,2,8,32], index: 0, kind: input, shape index: {}]   ;;  %s1106_s1 = inlined_call_operand.vmem [shape: bf16[2,2,8,32], index: 1, kind: input, shape index: {}, may-alias: {1,2}]   ;;  %s1107_s2 = inlined_call_operand.vmem [shape: bf16[2,2,8,32], index: 2, kind: input, shape index: {}, may-alias: {1,2}]   ;;  %s1108_s3 = inlined_call_operand.vmem [shape: bf16[2,8,32], index: 3, kind: output, shape index: {}]  }
   0x1   :  { %s998_s14 = smov 0  }
   0x2 LB: > { %s25_s15 = sadd.s32 1, %s960_s13  ;;  %p808_p0 = scmp.ge.s32.totalorder %s964_s14, 1  ;;  %s964_s14 = sphi %s998_s14, %s13_s14   ;;  %s960_s13 = sphi %s996_s13, %s1110_s13   ;;  %s956_s12 = sphi %s994_s12, %s1109_s12  }
   0x3   : > { %p27_p1 = scmp.ge.s32.totalorder %s25_s15, 2  ;;  %p174_p2 = scmp.lt.s32.totalorder %s964_s14, 3 }
   0x5   : > { %s1112_s15 = smov (%p27_p1, %s25_s15), 0  ;;  %p175_p3 = pnand %p808_p0, %p174_p2 }
   0x6   : > { %p211_p4 = scmp.lt.s32.totalorder (!%p175_p3), %s956_s12, 1  ;;  %v966_v0 = vmov (!%p175_p3), 0.0   ;;  %vm967_vm0 = vmmov (!%p175_p3), 0   ;;  %vm238_vm1 = vcmask (!%p175_p3), 64512   ;;  %s968_s23 = smov (!%p175_p3), 120   ;;  %vm298_vm2 = vcmask (!%p175_p3), 1043456  }
   0x7   : > { %178 = sbr.rel (%p175_p3) target bundleno = 1164 (0x48c), region = 32  ;;  %843 = vmatprep.subr.bf16.mxu0 (!%p175_p3), %v966_v0  ;;  %845 = vmatprep.mubr.msk.bf16.mxu0 (!%p175_p3), %vm967_vm0, %v966_v0  ;;  %s969_s24 = smov (!%p175_p3), 112   ;;  %vm696_vm3 = vcmask (!%p175_p3), 130048   ;;  %vm698_vm4 = vcmask (!%p175_p3), 195584   ;;  %vm701_vm5 = vcmask (!%p175_p3), 257024  }
   0x8   : > { %849 = vmatprep.subr.bf16.mxu1 (!%p175_p3), %v966_v0  ;;  %851 = vmatprep.mubr.msk.bf16.mxu1 (!%p175_p3), %vm967_vm0, %v966_v0  ;;  %s970_s25 = smov (!%p175_p3), 104   ;;  %s971_s29 = smov (!%p175_p3), 8  }
   0x9   : > { %s972_s30 = smov (!%p175_p3), 16   ;;  %s973_s4 = smov (!%p175_p3), 24  }
   0xe   : > { %s1114_s12 = smov (!%p211_p4, %s956_s12), 1 }
   0xf   : > { %s1018_s16 = sshll.u32 %s1114_s12, 2 }
  0x10   : > { %s221_s19 = scalar_lea.vmem %s1106_s1, %s1018_s16  ;;  %s217_s22 = scalar_lea.vmem %s1105_s0, %s1018_s16 }
  0x11   : > { %v236_v1 = vld [vmem:[%s221_s19] sm:$0xf]  ;;  %s753_s28 = scalar_lea.vmem %s1107_s2, %s1018_s16  ;;  %s233_s7 = scalar_lea.vmem %s1108_s3, %s1018_s16 }
  0x12   : > { %v243_v2 = vsel %vm238_vm1, %v236_v1, 0  ;;  %v235_v3 = vld [vmem:[%s217_s22] sm:$0xf]  ;;  %v817_v5 = vcombine.low %v236_v1, %v236_v1  ;;  %v813_v11 = vld [vmem:[%s753_s28 + $0x8] sm:$0xf] }
  0x13   : > { %844 = vmatpush3.bf16.xpose.msra.mxu0 %v243_v2  ;;  %v816_v4 = vcombine.low %v235_v3, %v235_v3  ;;  %v300_v12 = vsel %vm298_vm2, %v813_v11, 0  ;;  %v819_v41 = vcombine.low %v813_v11, %v813_v11 }
  0x14   : > { %861 = vmatprep.subr.bf16.mxu0 %v966_v0  ;;  %850 = vmatpush3.bf16.msra.mxu1 %v300_v12 }
  0x15   : > { %347 = vrot.lane.b32.xlu1 %v816_v4, %s968_s23  ;;  %855 = vmatprep.subr.bf16.mxu1 %v966_v0 }
  0x19   : > { %465 = vrot.lane.b32.xlu1 %v817_v5, %s969_s24 }
  0x1a   : > { %846 = vmatmul.mubr.msk.bf16.vlgmr.msra.gmra.mrb[0].mxu0 %vm238_vm1, %v235_v3 }
  0x1b   : > { %863 = vmatprep.mubr.msk.bf16.mxu0 %vm967_vm0, %v966_v0 }
  0x1d   : > { %463 = vrot.lane.b32.xlu1 %v816_v4, %s969_s24 }
  0x21   : > { %575 = vrot.lane.b32.xlu1 %v817_v5, %s970_s25 }
  0x25   : > { %573 = vrot.lane.b32.xlu1 %v816_v4, %s970_s25 }
  0x87   : > { %v348_v18 = vpop.permute.xlu1 %347 }
  0x8b   : > { %v466_v21 = vpop.permute.xlu1 %465 }
  0x8c   : > { %v471_v22 = vsel %vm238_vm1, %v466_v21, 0 }
  0x8f   : > { %v464_v23 = vpop.permute.xlu1 %463 }
  0x93   : > { %v576_v24 = vpop.permute.xlu1 %575 }
  0x94   : > { %v581_v25 = vsel %vm238_vm1, %v576_v24, 0 }
  0x97   : > { %v574_v26 = vpop.permute.xlu1 %573 }
  0xed   : > { %v279_v6 = vpop.f32.mrb[0].mxu0 }
  0xee   : > { %v847_v7 = vpop.f32.mrb[1].mxu0  ;;  %v285_v8 = vsel %vm238_vm1, %v279_v6, -inf }
  0xef   : > { %286 = vmax.xlane.f32.xlu0 %v285_v8  ;;  %v282_v9 = vpop.f32.mrb[2].mxu0 }
  0xf0   : > { %v848_v10 = vpop.f32.mrb[3].mxu0 }
 0x105   : > { %352 = vrot.lane.b32.xlu0 %v817_v5, %s968_s23 }
 0x17c   : > { %v287_v13 = vpop.xlane.xlu0 %286 }
 0x17d   : > { %v288_v14 = vsub.f32 %v279_v6, %v287_v13 }
 0x17f   : > { %v289_v15 = vmul.f32 1.442695, %v288_v14 }
 0x180   : > { %v353_v16 = vpop.permute.xlu0 %352 }
 0x181   : > { %926 = vpow2.f32 %v289_v15  ;;  %v358_v19 = vsel %vm238_vm1, %v353_v16, 0 }
 0x18b   : > { %v1046_v17 = vpop.eup %926 }
 0x18c   : > { %v294_v20 = vpack.c.bf16 %v1046_v17, %v1046_v17  ;;  %v291_v8 = vsel %vm238_vm1, %v1046_v17, 0.0 }
 0x18e   : > { %852 = vmatmul.mubr.msk.bf16.vlgmr.msra.gmra.mrb[0].mxu1 %vm238_vm1, %v294_v20 }
 0x18f   : > { %856 = vmatpush3.bf16.xpose.msra.mxu1 %v358_v19  ;;  %857 = vmatprep.mubr.msk.bf16.mxu1 %vm967_vm0, %v966_v0 }
 0x190   : > { %867 = vmatprep.subr.bf16.mxu1 %v966_v0 }
 0x196   : > { %858 = vmatmul.mubr.msk.bf16.vlgmr.msra.gmra.mrb[4].mxu1 %vm238_vm1, %v348_v18 }
 0x197   : > { %868 = vmatpush3.bf16.xpose.msra.mxu1 %v471_v22  ;;  %869 = vmatprep.mubr.msk.bf16.mxu1 %vm967_vm0, %v966_v0 }
 0x198   : > { %879 = vmatprep.subr.bf16.mxu1 %v966_v0 }
 0x19e   : > { %870 = vmatmul.mubr.msk.bf16.vlgmr.msra.gmra.mrb[8].mxu1 %vm238_vm1, %v464_v23 }
 0x19f   : > { %880 = vmatpush3.bf16.xpose.msra.mxu1 %v581_v25  ;;  %881 = vmatprep.mubr.msk.bf16.mxu1 %vm967_vm0, %v966_v0 }
 0x1a6   : > { %882 = vmatmul.mubr.msk.bf16.vlgmr.msra.gmra.mrb[12].mxu1 %vm238_vm1, %v574_v26 }
 0x261   : > { %v1065_v27 = vpop.f32.mrb[0].mxu1 }
 0x262   : > { %v853_v28 = vpop.f32.mrb[1].mxu1 }
 0x263   : > { %v339_v29 = vpop.f32.mrb[2].mxu1 }
 0x264   : > { %v854_v30 = vpop.f32.mrb[3].mxu1 }
 0x269   : > { %v394_v31 = vpop.f32.mrb[4].mxu1 }
 0x26a   : > { %v859_v32 = vpop.f32.mrb[5].mxu1  ;;  %v400_v33 = vsel %vm238_vm1, %v394_v31, -inf }
 0x26b   : > { %401 = vmax.xlane.f32.xlu1 %v400_v33  ;;  %v397_v34 = vpop.f32.mrb[6].mxu1 }
 0x26c   : > { %v860_v35 = vpop.f32.mrb[7].mxu1 }
 0x271   : > { %v507_v36 = vpop.f32.mrb[8].mxu1 }
 0x272   : > { %v513_v37 = vsel %vm238_vm1, %v507_v36, -inf  ;;  %v871_v38 = vpop.f32.mrb[9].mxu1 }
 0x273   : > { %514 = vmax.xlane.f32.xlu0 %v513_v37  ;;  %v510_v39 = vpop.f32.mrb[10].mxu1 }
 0x274   : > { %v872_v40 = vpop.f32.mrb[11].mxu1 }
 0x279   : > { %v617_v42 = vpop.f32.mrb[12].mxu1 }
 0x27a   : > { %v883_v43 = vpop.f32.mrb[13].mxu1  ;;  %v623_v46 = vsel %vm238_vm1, %v617_v42, -inf }
 0x27b   : > { %v620_v44 = vpop.f32.mrb[14].mxu1 }
 0x27c   : > { %523 = vrot.lane.b32.xlu1 %v819_v41, %s969_s24  ;;  %v884_v45 = vpop.f32.mrb[15].mxu1 }
 0x289   : > { %413 = vrot.lane.b32.xlu0 %v819_v41, %s968_s23 }
 0x2a0   : > { %624 = vmax.xlane.f32.xlu1 %v623_v46 }
 0x2b1   : > { %633 = vrot.lane.b32.xlu1 %v819_v41, %s970_s25 }
 0x2f8   : > { %v402_v47 = vpop.xlane.xlu1 %401 }
 0x2f9   : > { %v403_v48 = vsub.f32 %v394_v31, %v402_v47 }
 0x2fb   : > { %v404_v49 = vmul.f32 1.442695, %v403_v48 }
 0x2fc   : > { %v524_v56 = vpop.permute.xlu1 %523 }
 0x2fd   : > { %928 = vpow2.f32 %v404_v49  ;;  %v529_v59 = vsel %vm298_vm2, %v524_v56, 0 }
 0x300   : > { %v515_v50 = vpop.xlane.xlu0 %514 }
 0x301   : > { %v516_v51 = vsub.f32 %v507_v36, %v515_v50 }
 0x303   : > { %v517_v52 = vmul.f32 1.442695, %v516_v51 }
 0x304   : > { %v414_v53 = vpop.permute.xlu0 %413 }
 0x305   : > { %930 = vpow2.f32 %v517_v52  ;;  %v419_v54 = vsel %vm298_vm2, %v414_v53, 0 }
 0x306   : > { %862 = vmatpush3.bf16.msra.mxu0 %v419_v54 }
 0x307   : > { %v929_v55 = vpop.eup %928  ;;  %873 = vmatprep.subr.bf16.mxu0 %v966_v0 }
 0x308   : > { %v406_v57 = vsel %vm238_vm1, %v929_v55, 0.0  ;;  %v409_v58 = vpack.c.bf16 %v929_v55, %v929_v55 }
 0x309   : > { %407 = vadd.xlane.f32.xlu0 %v406_v57 }
 0x30a   : > { %864 = vmatmul.mubr.msk.bf16.vlgmr.msra.gmra.mrb[4].mxu0 %vm238_vm1, %v409_v58 }
 0x30b   : > { %874 = vmatpush3.bf16.msra.mxu0 %v529_v59  ;;  %875 = vmatprep.mubr.msk.bf16.mxu0 %vm967_vm0, %v966_v0 }
 0x30c   : > { %885 = vmatprep.subr.bf16.mxu0 %v966_v0 }
 0x30f   : > { %v931_v60 = vpop.eup %930 }
 0x310   : > { %v519_v61 = vsel %vm238_vm1, %v931_v60, 0.0  ;;  %v522_v62 = vpack.c.bf16 %v931_v60, %v931_v60 }
 0x311   : > { %520 = vadd.xlane.f32.xlu1 %v519_v61 }
 0x312   : > { %876 = vmatmul.mubr.msk.bf16.vlgmr.msra.gmra.mrb[8].mxu0 %vm238_vm1, %v522_v62 }
 0x313   : > { %887 = vmatprep.mubr.msk.bf16.mxu0 %vm967_vm0, %v966_v0 }
 0x32d   : > { %v625_v63 = vpop.xlane.xlu1 %624 }
 0x32e   : > { %v626_v1 = vsub.f32 %v617_v42, %v625_v63 }
 0x330   : > { %v627_v2 = vmul.f32 1.442695, %v626_v1 }
 0x331   : > { %v634_v3 = vpop.permute.xlu1 %633 }
 0x332   : > { %932 = vpow2.f32 %v627_v2  ;;  %v639_v4 = vsel %vm298_vm2, %v634_v3, 0 }
 0x333   : > { %886 = vmatpush3.bf16.msra.mxu0 %v639_v4 }
 0x33c   : > { %v933_v5 = vpop.eup %932 }
 0x33d   : > { %v629_v6 = vsel %vm238_vm1, %v933_v5, 0.0  ;;  %v632_v7 = vpack.c.bf16 %v933_v5, %v933_v5 }
 0x33e   : > { %630 = vadd.xlane.f32.xlu0 %v629_v6 }
 0x33f   : > { %888 = vmatmul.mubr.msk.bf16.vlgmr.msra.gmra.mrb[12].mxu0 %vm238_vm1, %v632_v7 }
 0x342   : > { %292 = vadd.xlane.f32.xlu0 %v291_v8 }
 0x396   : > { %v408_v0 = vpop.xlane.xlu0 %407 }
 0x397   : > { %934 = vrcp.f32 %v408_v0 }
 0x39e   : > { %v521_v9 = vpop.xlane.xlu1 %520 }
 0x39f   : > { %936 = vrcp.f32 %v521_v9 }
 0x3a1   : > { %v935_v10 = vpop.eup %934 }
 0x3a9   : > { %v937_v16 = vpop.eup %936 }
 0x3cb   : > { %v631_v22 = vpop.xlane.xlu0 %630 }
 0x3cc   : > { %938 = vrcp.f32 %v631_v22 }
 0x3cf   : > { %v293_v30 = vpop.xlane.xlu0 %292 }
 0x3d0   : > { %940 = vrcp.f32 %v293_v30 }
 0x3d6   : > { %v939_v23 = vpop.eup %938 }
 0x3da   : > { %v941_v31 = vpop.eup %940 }
 0x3db   : > { %v343_v33 = vmul.f32 %v941_v31, %v1065_v27 }
 0x3dd   : > { %v455_v11 = vpop.f32.mrb[4].mxu0 }
 0x3de   : > { %v462_v12 = vmul.f32 %v935_v10, %v455_v11  ;;  %v865_v13 = vpop.f32.mrb[5].mxu0 }
 0x3df   : > { %v458_v14 = vpop.f32.mrb[6].mxu0 }
 0x3e0   : > { %684 = vrot.lane.b32.xlu1 %v462_v12, %s971_s29  ;;  %v866_v15 = vpop.f32.mrb[7].mxu0 }
 0x3e5   : > { %v565_v18 = vpop.f32.mrb[8].mxu0 }
 0x3e6   : > { %v572_v19 = vmul.f32 %v937_v16, %v565_v18  ;;  %v877_v20 = vpop.f32.mrb[9].mxu0 }
 0x3e7   : > { %v568_v21 = vpop.f32.mrb[10].mxu0 }
 0x3e8   : > { %688 = vrot.lane.b32.xlu0 %v572_v19, %s972_s30  ;;  %v878_v17 = vpop.f32.mrb[11].mxu0 }
 0x412   : > { %v675_v24 = vpop.f32.mrb[12].mxu0 }
 0x413   : > { %v682_v25 = vmul.f32 %v939_v23, %v675_v24  ;;  %v889_v26 = vpop.f32.mrb[13].mxu0 }
 0x414   : > { %v678_v28 = vpop.f32.mrb[14].mxu0 }
 0x415   : > { %692 = vrot.lane.b32.xlu1 %v682_v25, %s973_s4  ;;  %v890_v29 = vpop.f32.mrb[15].mxu0 }
 0x452   : > { %v685_v32 = vpop.permute.xlu1 %684 }
 0x453   : > { %v695_v35 = vsel %vm238_vm1, %v343_v33, %v685_v32 }
 0x45a   : > { %v689_v34 = vpop.permute.xlu0 %688 }
 0x45b   : > { %v697_v36 = vsel %vm696_vm3, %v695_v35, %v689_v34 }
 0x487   : > { %v693_v37 = vpop.permute.xlu1 %692 }
 0x488   : > { %v699_v38 = vsel %vm698_vm4, %v697_v36, %v693_v37 }
 0x489   : > { %v700_v39 = vpack.c.bf16 %v699_v38, %v699_v38 }
 0x48b   : > { %702 = vst.msk [vmem:[%s233_s7] sm:$0xf] %vm701_vm5, %v700_v39 }
 0x48c PF: > { %s13_s14 = sadd.s32 1, %s964_s14   ;;  %s1109_s12 = smov %s960_s13 }
 0x48d   : > { %p10_p5 = scmp.ge.s32.totalorder %s13_s14, 4   ;;  %s1110_s13 = smov %s1112_s15 }
 0x48f   :  { %12 = sbr.rel (!%p10_p5) target bundleno = 2 (0x2), region = 68 }

// kernel: map_encoder_forward.17
= control target key start
LH: loop header
LB: loop body
LE: loop exit
PB: predicated region body
PF: predicated region fallthrough
CT: control target
= control target key end

     0   :  { %12 = vsyncpa [#allocation4], 0  ;;  %s1113_s0 = inlined_call_operand.vmem [shape: f32[16,32], index: 0, kind: input, shape index: {}]   ;;  %s1114_s1 = inlined_call_operand.vmem [shape: bf16[32,128], index: 1, kind: input, shape index: {}]   ;;  %s1115_s2 = inlined_call_operand.vmem [shape: f32[1,128], index: 2, kind: input, shape index: {}]   ;;  %s1116_s3 = inlined_call_operand.vmem [shape: bf16[128,32], index: 3, kind: input, shape index: {}]   ;;  %s1117_s4 = inlined_call_operand.vmem [shape: f32[1,32], index: 4, kind: input, shape index: {}]   ;;  %s1118_s5 = inlined_call_operand.vmem [shape: f32[1,32], index: 5, kind: input, shape index: {}]   ;;  %s1119_s6 = inlined_call_operand.vmem [shape: f32[1,32], index: 6, kind: input, shape index: {}]   ;;  %s1120_s7 = inlined_call_operand.hbm [shape: f32[16,32], index: 7, kind: output, shape index: {}]  }
   0x1   :  { %14 = vsyncpa [#allocation4 + $0x1], 0  ;;  %s953_s24 = smov 0   ;;  %s955_s25 = smov 0  }
   0x2   :  { %s957_s26 = smov 0   ;;  %s959_s27 = smov 0  }
   0x3   :  { %s961_s28 = smov 0   ;;  %s963_s29 = smov 0  }
   0x4 LB: > { %s692_s30 = sadd.s32 4294967295, %s908_s29   ;;  %s693_s8 = sadd.s32 4294967294, %s908_s29   ;;  %s908_s29 = sphi %s963_s29, %s20_s29   ;;  %s904_s28 = sphi %s961_s28, %s1127_s28   ;;  %s900_s27 = sphi %s959_s27, %s1126_s27   ;;  %s896_s26 = sphi %s957_s26, %s1125_s26   ;;  %s892_s25 = sphi %s955_s25, %s1124_s25   ;;  %s888_s24 = sphi %s953_s24, %s1123_s24  }
   0x5   : > { %s32_s9 = sadd.s32 1, %s904_s28  ;;  %s206_s10 = sadd.s32 1, %s896_s26 }
   0x6   : > { %p34_p0 = scmp.ge.s32.totalorder %s32_s9, 2  ;;  %p216_p1 = scmp.ne.s32.totalorder %s896_s26, %s892_s25 }
   0x7   : > { %p217_p2 = scmp.eq.s32.totalorder %s692_s30, 1  ;;  %p222_p3 = scmp.ne.s32.totalorder %s892_s25, %s888_s24 }
   0x8   : > { %s1129_s9 = smov (%p34_p0, %s32_s9), 0  ;;  %p223_p5 = scmp.eq.s32.totalorder %s693_s8, 1 }
   0x9   : > { %p993_p4 = por %p217_p2, %p216_p1  ;;  %s203_s12 = ssub.s32 %s904_s28, %s1129_s9 }
   0xa   : > { %p699_p6 = scmp.ge.s32.totalorder %s908_s29, 1  ;;  %p204_p7 = scmp.eq.s32.totalorder %s203_s12, 0 }
   0xb   : > { %p1000_p8 = por %p223_p5, %p222_p3  ;;  %p279_p9 = scmp.lt.s32.totalorder %s908_s29, 3 }
   0xc   : > { %s1006_s14 = scalar_select %p204_p7, %s896_s26, %s206_s10  }
   0xd   : > { %p280_p10 = pnand %p699_p6, %p279_p9 }
   0xe   : > { %v818_v0 = vld [vmem:[%s1114_s1] sm:$0xff] (!%p280_p10)   ;;  %v910_v1 = vmov (!%p280_p10), 0.0   ;;  %v819_v2 = vld [vmem:[%s1114_s1 + $0x8] sm:$0xff] (!%p280_p10)   ;;  %vm911_vm0 = vmmov (!%p280_p10), 0   ;;  %p322_p11 = scmp.lt.s32.totalorder (!%p280_p10), %s900_s27, 1  ;;  %vm344_vm1 = vcmask (!%p280_p10), 261120  }
   0xf   : > { %283 = sbr.rel (%p280_p10) target bundleno = 800 (0x320), region = 48  ;;  %733 = vmatprep.subr.bf16.mxu0 (!%p280_p10), %v910_v1  ;;  %741 = vmatprep.subr.bf16.mxu1 (!%p280_p10), %v910_v1  ;;  %345 = vst.msk [vmem:[#allocation2] sm:$0xff] (!%p280_p10), %vm344_vm1, %v910_v1  ;;  %v820_v3 = vld [vmem:[%s1116_s3] sm:$0xff] (!%p280_p10)   ;;  %v821_v4 = vld [vmem:[%s1116_s3 + $0x8] sm:$0xff] (!%p280_p10)   ;;  %v822_v6 = vld [vmem:[%s1116_s3 + $0x10] sm:$0xff] (!%p280_p10)   ;;  %s319_s18 = sand.u32 (!%p280_p10), 1, %s892_s25  }
  0x10   : > { %734 = vmatpush3.bf16.msra.mxu0 (!%p280_p10), %v818_v0  ;;  %737 = vmatprep.mubr.msk.bf16.mxu0 (!%p280_p10), %vm911_vm0, %v910_v1  ;;  %v823_v8 = vld [vmem:[%s1116_s3 + $0x18] sm:$0xff] (!%p280_p10)   ;;  %v824_v9 = vld [vmem:[%s1116_s3 + $0x20] sm:$0xff] (!%p280_p10)   ;;  %v825_v10 = vld [vmem:[%s1116_s3 + $0x28] sm:$0xff] (!%p280_p10)   ;;  %s700_s19 = sshll.u32 (!%p280_p10), %s319_s18, 3  ;;  %s570_s17 = scalar_lea.sflag (!%p280_p10), [#allocation4], %s319_s18 }
  0x11   : > { %735 = vmatprep.subr.bf16.mxu0 (!%p280_p10), %v910_v1  ;;  %757 = vmatprep.mubr.msk.bf16.mxu1 (!%p280_p10), %vm911_vm0, %v910_v1  ;;  %v826_v11 = vld [vmem:[%s1116_s3 + $0x30] sm:$0xff] (!%p280_p10)   ;;  %v827_v12 = vld [vmem:[%s1116_s3 + $0x38] sm:$0xff] (!%p280_p10)   ;;  %v702_v13 = vld [vmem:[%s1115_s2] ss:$0 sm:$0xff] (!%p280_p10)  ;;  %s321_s8 = scalar_lea.vmem (!%p280_p10), [#allocation3], %s700_s19 }
  0x12   : > { %742 = vmatpush3.bf16.msra.mxu1 (!%p280_p10), %v820_v3  ;;  %v714_v28 = vld [vmem:[%s1117_s4] ss:$0 sm:$0xff] (!%p280_p10)  ;;  %s583_s10 = sshll.u32 (!%p280_p10), %s321_s8, 4  ;;  %s1067_s10 = int_to_ptr.vmem [resolvable:$true] %s583_s10 }
  0x13   : > { %743 = vmatprep.subr.bf16.mxu1 (!%p280_p10), %v910_v1  ;;  %v715_v41 = vld [vmem:[%s1118_s5] ss:$0 sm:$0xff] (!%p280_p10)  ;;  %s830_s20 = scalar_lea.vmem (!%p280_p10), %s1067_s10, 128 }
  0x14   : > { %736 = vmatpush3.bf16.msra.mxu0 (!%p280_p10), %v819_v2  ;;  %v716_v43 = vld [vmem:[%s1119_s6] ss:$0 sm:$0xff] (!%p280_p10)  ;;  %p831_p12 = scmp.ne.s32.totalorder (!%p280_p10), %s1067_s10, %s830_s20 }
  0x16   : > { %s323_s21 = scalar_select %p322_p11, %s900_s27, 1  ;;  %744 = vmatpush3.bf16.msra.mxu1 %v821_v4  ;;  %v416_v21 = vld [vmem:[#allocation2] sm:$0xff] }
  0x17   : > { %745 = vmatprep.subr.bf16.mxu1 %v910_v1  ;;  %p832_p13 = pnand %p831_p12, %p993_p4 }
  0x18   : > { %s701_s30 = sshll.u32 %s323_s21, 3 }
  0x19   : > { %s325_s12 = scalar_lea.vmem %s1113_s0, %s701_s30  ;;  %s718_s30 = sshll.u32 %s900_s27, 7 }
  0x1a   : > { %v346_v5 = vld [vmem:[%s325_s12] sm:$0xff]  ;;  %746 = vmatpush3.bf16.msra.mxu1 %v822_v6  ;;  %s1065_s16 = scalar_lea.hbm %s1120_s7, %s718_s30  ;;  %p833_p0 = pneg %p832_p13 }
  0x1b   : > { %v347_v7 = vpack.c.bf16 %v346_v5, %v346_v5  ;;  %747 = vmatprep.subr.bf16.mxu1 %v910_v1  ;;  %s912_s27 = smov [#allocation3]  }
  0x1c   : > { %s834_s19 = sshll.u32 %s912_s27, 4  ;;  %s835_s19 = int_to_ptr.vmem [resolvable:$false] %s834_s19 }
  0x1d   : > { %738 = vmatmul.mubr.msk.bf16.vlgmr.msra.gmra.mrb[0].mxu0 %vm344_vm1, %v347_v7  ;;  %s836_s21 = scalar_lea.vmem %s835_s19, 256  ;;  %p837_p1 = scmp.lt.s32.totalorder %s1067_s10, %s835_s19 }
  0x1e   : > { %748 = vmatpush3.bf16.msra.mxu1 %v823_v8  ;;  %p838_p2 = scmp.lt.s32.totalorder %s836_s21, %s830_s20 }
  0x1f   : > { %749 = vmatprep.subr.bf16.mxu1 %v910_v1 }
  0x20   : > { %p839_p3 = por %p838_p2, %p837_p1 }
  0x22   : > { %750 = vmatpush3.bf16.msra.mxu1 %v824_v9  ;;  %p840_p5 = pnand %p839_p3, %p833_p0 }
  0x23   : > { %751 = vmatprep.subr.bf16.mxu1 %v910_v1 }
  0x26   : > { %752 = vmatpush3.bf16.msra.mxu1 %v825_v10 }
  0x27   : > { %753 = vmatprep.subr.bf16.mxu1 %v910_v1 }
  0x2a   : > { %754 = vmatpush3.bf16.msra.mxu1 %v826_v11 }
  0x2b   : > { %755 = vmatprep.subr.bf16.mxu1 %v910_v1 }
  0x2e   : > { %756 = vmatpush3.bf16.msra.mxu1 %v827_v12 }
  0xf0   : > { %v409_v14 = vpop.f32.mrb[0].mxu0 }
  0xf1   : > { %v410_v15 = vadd.f32 %v702_v13, %v409_v14  ;;  %v739_v16 = vpop.f32.mrb[1].mxu0 }
  0xf2   : > { %v412_v17 = vpop.f32.mrb[2].mxu0 }
  0xf3   : > { %v415_v18 = vmax.f32 %v410_v15, 0.0  ;;  %v740_v19 = vpop.f32.mrb[3].mxu0 }
  0xf5   : > { %v417_v20 = vpack.c.bf16 %v415_v18, %v415_v18 }
  0xf7   : > { %758 = vmatmul.mubr.bf16.vlgmr.msra.gmra.mrb[0].mxu1 %v417_v20 }
 0x1ca   : > { %v516_v22 = vpop.f32.mrb[0].mxu1 }
 0x1cb   : > { %v522_v23 = vadd.f32 %v516_v22, %v416_v21  ;;  %v759_v24 = vpop.f32.mrb[1].mxu1 }
 0x1cc   : > { %v519_v25 = vpop.f32.mrb[2].mxu1 }
 0x1cd   : > { %523 = vst.msk [vmem:[#allocation2] sm:$0xff] %vm344_vm1, %v522_v23  ;;  %v760_v26 = vpop.f32.mrb[3].mxu1 }
 0x1d4   : > { %v528_v27 = vld [vmem:[#allocation2] sm:$0xff] }
 0x1d5   : > { %v529_v29 = vadd.f32 %v528_v27, %v346_v5 }
 0x1d7   : > { %v537_v30 = vadd.f32 %v714_v28, %v529_v29 }
 0x1d9   : > { %v538_v31 = vsel %vm344_vm1, %v537_v30, 0.0 }
 0x1da   : > { %539 = vadd.xlane.f32.xlu0 %v538_v31 }
 0x267   : > { %v540_v32 = vpop.xlane.xlu0 %539 }
 0x268   : > { %v542_v33 = vmul.f32 0.03125, %v540_v32 }
 0x26a   : > { %v543_v34 = vsub.f32 %v537_v30, %v542_v33 }
 0x26c   : > { %v544_v35 = vmul.f32 %v543_v34, %v543_v34 }
 0x26e   : > { %v545_v36 = vsel %vm344_vm1, %v544_v35, 0.0 }
 0x26f   : > { %546 = vadd.xlane.f32.xlu0 %v545_v36 }
 0x2fc   : > { %v547_v37 = vpop.xlane.xlu0 %546 }
 0x2fd   : > { %v548_v38 = vmul.f32 0.03125, %v547_v37 }
 0x2ff   : > { %v549_v39 = vadd.f32 1e-05, %v548_v38 }
 0x301   : > { %828 = vrsqrt.f32 %v549_v39 }
 0x30b   : > { %v829_v40 = vpop.eup %828 }
 0x30c   : > { %v551_v42 = vmul.f32 %v829_v40, %v543_v34 }
 0x30e   : > { %v559_v44 = vmul.f32 %v715_v41, %v551_v42 }
 0x310   : > { %v567_v45 = vadd.f32 %v716_v43, %v559_v44 }
 0x312   : > { %568 = vst.msk [vmem:[%s321_s8] sm:$0xff] %vm344_vm1, %v567_v45 }
 0x313   : > { %843 = shalt.err (!%p840_p5)
}
 0x314   : > { %s844_s18 = scalar_lea.hbm %s1065_s16, 128  ;;  %s848_s30 = scalar_lea.hbm %s1120_s7, 256 }
 0x315   : > { %p845_p6 = scmp.ne.s32.totalorder %s1065_s16, %s844_s18  ;;  %p849_p10 = scmp.lt.u32.totalorder %s1065_s16, %s1120_s7 }
 0x316   : > { %p850_p11 = scmp.lt.u32.totalorder %s848_s30, %s844_s18  ;;  %p852_p13 = scmp.lt.u32.totalorder %s844_s18, %s1065_s16 }
 0x317   : > { %p846_p7 = pnand %p845_p6, %p993_p4 }
 0x318   : > { %p851_p12 = por %p850_p11, %p849_p10 }
 0x319   : > { %p847_p9 = pneg %p846_p7 }
 0x31a   : > { %p853_p0 = por %p852_p13, %p851_p12 }
 0x31c   : > { %p854_p1 = pnand %p853_p0, %p847_p9 }
 0x31e   : > { %857 = shalt.err (!%p854_p1)
}
 0x31f   : > { %761 = dma.vmem_to_hbm [thread:$0]  (%p993_p4), %s1067_s10, 128, %s1065_s16, %s570_s17  }
 0x320 PF: > { %p767_p2 = scmp.ge.s32.totalorder %s908_s29, 2  ;;  %s595_s15 = sand.u32 1, %s888_s24  }
 0x321   : > { %s596_s20 = scalar_lea.sflag [#allocation4], %s595_s15 }
 0x322   : > { %p764_p3 = pnand %p767_p2, %p1000_p8 }
 0x324   : > { %883 = dma.done.wait (!%p764_p3), %s596_s20, 128  }
 0x325   : > { %885 = vsyncadd (!%p764_p3), %s596_s20, 4294967168  ;;  %s20_s29 = sadd.s32 1, %s908_s29   ;;  %s1123_s24 = smov %s892_s25 }
 0x326   : > { %p17_p5 = scmp.ge.s32.totalorder %s20_s29, 4   ;;  %s1124_s25 = smov %s896_s26 }
 0x327   : > { %s1125_s26 = smov %s1006_s14  ;;  %s1126_s27 = smov %s904_s28 }
 0x328   : > { %s1127_s28 = smov %s1129_s9  ;;  %19 = sbr.rel (!%p17_p5) target bundleno = 4 (0x4), region = 100 }
 0x32f   :  { %601 = vsyncpa [#allocation4], 1 }
 0x330   :  { %603 = vsyncpa [#allocation4 + $0x1], 1 }

</bundles_post_ra>
